<compile_context>
chip_gen: v7x
topology: tpu7x:2x2x1
jax: 0.10.0
libtpu: 0.0.40
codegen_flags: <defaults>
</compile_context>

<pallas_src>
import functools
import math

import jax
import jax.numpy as jnp
from jax import lax
from jax.experimental import pallas as pl
from jax.experimental.pallas import tpu as pltpu


# ----------------------------- helpers ----------------------------------------

def _layernorm(x, gamma, beta, eps):
    mu = jnp.mean(x, axis=-1, keepdims=True)
    d = x - mu
    var = jnp.mean(d * d, axis=-1, keepdims=True)
    return d * lax.rsqrt(var + eps) * gamma + beta


def _default_vmem_limit_bytes():
    # ~96 MiB on 128-MiB-VMEM chips (v5e/v6e), ~54 MiB on 64-MiB v7x.
    try:
        cap = pltpu.get_tpu_info().vmem_capacity_bytes
    except Exception:
        cap = 128 * 1024 * 1024
    return int(min(96 * 1024 * 1024, 0.85 * cap))


def _const_spec(shape):
    """Whole-array VMEM spec for weights: constant index_map => single-buffer it
    (double-buffering buys zero prefetch and only doubles residency)."""
    nd = len(shape)
    idx = lambda b, q, _nd=nd: (0,) * _nd
    try:
        return pl.BlockSpec(shape, idx, pipeline_mode=pl.Buffered(1))
    except (TypeError, AttributeError):   # older jax without pipeline_mode/Buffered
        return pl.BlockSpec(shape, idx)


# ----------------------------- Pallas kernel -----------------------------------

def _bert_layer_kernel(h_ref, mask_ref,
                       wq_ref, bq_ref, wk_ref, bk_ref, wv_ref, bv_ref,
                       wo_ref, bo_ref, ln1g_ref, ln1b_ref,
                       wi_ref, bi_ref, wd_ref, bd_ref, ln2g_ref, ln2b_ref,
                       out_ref, kv_ref, ctx_ref,
                       *, num_heads, head_dim, ln_eps, gelu_tanh):
    # h_ref block: (1, S, H); mask_ref: (1, 1, S); out_ref: (1, Sq, H)
    # kv_ref scratch: (2, S, H) bf16 — K/V of the full sequence, persistent across
    #                 query tiles of one batch row (q axis is "arbitrary").
    # ctx_ref scratch: (Sq, H) bf16 — per-head contexts written in place.
    S, H = h_ref.shape[1], h_ref.shape[2]
    Sq = out_ref.shape[1]
    qi = pl.program_id(1)

    mask = mask_ref[0].astype(jnp.float32)                  # (1, S) additive mask

    # ---- K/V projection: once per batch row, reused by every query tile ----------
    @pl.when(qi == 0)
    def _():
        x_all_bf = h_ref[0].astype(jnp.bfloat16)             # (S, H)
        k = jnp.dot(x_all_bf, wk_ref[...],
                    preferred_element_type=jnp.float32) + bk_ref[...]
        v = jnp.dot(x_all_bf, wv_ref[...],
                    preferred_element_type=jnp.float32) + bv_ref[...]
        kv_ref[0] = k.astype(jnp.bfloat16)
        kv_ref[1] = v.astype(jnp.bfloat16)

    # ---- Q projection for this query tile only ------------------------------------
    row0 = pl.multiple_of(qi * Sq, Sq)
    x_tile = h_ref[0, pl.ds(row0, Sq), :]                    # (Sq, H) input dtype
    x_tile_f32 = x_tile.astype(jnp.float32)                  # residual path (f32)
    q = jnp.dot(x_tile.astype(jnp.bfloat16), wq_ref[...],
                preferred_element_type=jnp.float32) + bq_ref[...]
    q_bf = q.astype(jnp.bfloat16)                            # (Sq, H)

    k_all = kv_ref[0]                                        # (S, H) bf16
    v_all = kv_ref[1]

    # ---- multi-head self-attention -------------------------------------------------
    scale = 1.0 / math.sqrt(head_dim)
    contract_last = (((1,), (1,)), ((), ()))                 # q·kᵀ without K transpose
    for h in range(num_heads):                               # static, unrolled
        sl = slice(h * head_dim, (h + 1) * head_dim)
        scores = lax.dot_general(q_bf[:, sl], k_all[:, sl], contract_last,
                                 preferred_element_type=jnp.float32) * scale
        scores = scores + mask                               # (Sq, S) + (1, S)
        scores = scores - jnp.max(scores, axis=-1, keepdims=True)
        p_attn = jnp.exp(scores)
        p_attn = p_attn * pl.reciprocal(jnp.sum(p_attn, axis=-1, keepdims=True),
                                        approx=True)
        ctx_h = jnp.dot(p_attn.astype(jnp.bfloat16), v_all[:, sl],
                        preferred_element_type=jnp.float32)  # (Sq, hd)
        ctx_ref[:, sl] = ctx_h.astype(jnp.bfloat16)          # no lane-axis concatenate
    # TODO(synk): fully-batched head formulation (head-major (nh, Sq|S, hd) via
    # pltpu.einshape + batched dot_general) removes the 64-lane head slices entirely;
    # pending validation of the lane-splitting relayout on the target Mosaic version.

    # Full (Sq, H) context hits the (H, H) output projection in ONE matmul.
    attn_out = jnp.dot(ctx_ref[...], wo_ref[...],
                       preferred_element_type=jnp.float32) + bo_ref[...]
    h1 = _layernorm(attn_out + x_tile_f32, ln1g_ref[...], ln1b_ref[...], ln_eps)

    # ---- feed-forward ---------------------------------------------------------------
    inter = jnp.dot(h1.astype(jnp.bfloat16), wi_ref[...],
                    preferred_element_type=jnp.float32) + bi_ref[...]
    if gelu_tanh:
        # tanh-approx GELU: EUP tanh instead of VALU erf polynomial (v5e relief).
        c = math.sqrt(2.0 / math.pi)
        inter = 0.5 * inter * (1.0 + jnp.tanh(c * (inter + 0.044715 * inter * inter * inter)))
    else:
        # exact (erf-based) GELU, matching HF "gelu"
        inter = 0.5 * inter * (1.0 + lax.erf(inter * (1.0 / math.sqrt(2.0))))
    ffo = jnp.dot(inter.astype(jnp.bfloat16), wd_ref[...],
                  preferred_element_type=jnp.float32) + bd_ref[...]
    out = _layernorm(ffo + h1, ln2g_ref[...], ln2b_ref[...], ln_eps)

    out_ref[0] = out.astype(out_ref.dtype)


# ------------------------------ wrappers ----------------------------------------

def bert_layer_pallas(hidden, mask_add, p, *, num_heads, ln_eps=1e-12,
                      seq_tile=None, gelu_tanh=False, vmem_limit_bytes=None):
    B, S, H = hidden.shape
    I = p["wi"].shape[1]
    assert H % num_heads == 0
    head_dim = H // num_heads

    # Query-tile size: keep the MXU M dim large and grid-step overhead low; bound
    # score/activation residency only for long sequences (Sq>=256 keeps the 256x256
    # MXU fed on v6e/v7x; 128-MiB v5e/v6e comfortably fit Sq=512).
    if seq_tile is None:
        if S <= 512:
            seq_tile = S
        else:
            seq_tile = S
            for t in (512, 256, 128):
                if S % t == 0:
                    seq_tile = t
                    break
    sub = 16 if hidden.dtype == jnp.bfloat16 else 8
    assert S % seq_tile == 0 and (seq_tile == S or seq_tile % sub == 0)
    nq = S // seq_tile
    # TODO(synk): on v7x with B == 1 and nq == 1, split queries into >=2 "parallel"
    # tiles (dropping the K/V scratch reuse) so both TensorCores have work.

    bf16 = jnp.bfloat16
    wq = p["wq"].astype(bf16); wk = p["wk"].astype(bf16); wv = p["wv"].astype(bf16)
    wo = p["wo"].astype(bf16); wi = p["wi"].astype(bf16); wd = p["wd"].astype(bf16)

    kernel = functools.partial(_bert_layer_kernel, num_heads=num_heads,
                               head_dim=head_dim, ln_eps=ln_eps, gelu_tanh=gelu_tanh)

    if vmem_limit_bytes is None:
        vmem_limit_bytes = _default_vmem_limit_bytes()

    # TODO(synk): at BERT-large scale on v7x (64 MiB VMEM), additionally tile wi/wd
    # over the intermediate dimension (N in 256-chunks).
    in_specs = [
        pl.BlockSpec((1, S, H), lambda b, q: (b, 0, 0)),   # hidden (full seq, for K/V)
        pl.BlockSpec((1, 1, S), lambda b, q: (b, 0, 0)),   # additive mask
        _const_spec((H, H)), _const_spec((1, H)),          # wq, bq
        _const_spec((H, H)), _const_spec((1, H)),          # wk, bk
        _const_spec((H, H)), _const_spec((1, H)),          # wv, bv
        _const_spec((H, H)), _const_spec((1, H)),          # wo, bo
        _const_spec((1, H)), _const_spec((1, H)),          # ln1 gamma / beta
        _const_spec((H, I)), _const_spec((1, I)),          # wi, bi
        _const_spec((I, H)), _const_spec((1, H)),          # wd, bd
        _const_spec((1, H)), _const_spec((1, H)),          # ln2 gamma / beta
    ]

    return pl.pallas_call(
        kernel,
        out_shape=jax.ShapeDtypeStruct((B, S, H), hidden.dtype),
        grid=(B, nq),
        in_specs=in_specs,
        out_specs=pl.BlockSpec((1, seq_tile, H), lambda b, q: (b, q, 0)),
        scratch_shapes=[pltpu.VMEM((2, S, H), jnp.bfloat16),        # persistent K/V
                        pltpu.VMEM((seq_tile, H), jnp.bfloat16)],   # per-tile context
        compiler_params=pltpu.CompilerParams(
            # q axis carries the K/V scratch across tiles of one batch row -> arbitrary
            dimension_semantics=("parallel", "arbitrary" if nq > 1 else "parallel"),
            vmem_limit_bytes=vmem_limit_bytes),
    )(hidden, mask_add,
      wq, p["bq"], wk, p["bk"], wv, p["bv"],
      wo, p["bo"], p["ln1_g"], p["ln1_b"],
      wi, p["bi"], wd, p["bd"], p["ln2_g"], p["ln2_b"])


def bert_encoder_pallas(hidden, mask_add, layer_params, *, num_heads,
                        carry_dtype=None, **layer_kwargs):
    # TODO(synk): head_mask / cross-attention / past_key_values / use_cache /
    # output_attentions / output_hidden_states / gradient checkpointing are
    # inference-irrelevant here (None / eval mode) and not implemented.
    # TODO(synk): hide the per-layer weight reload (biggest on v5e's ~820 GB/s HBM):
    # cross-pallas_call weight-prefetch future (P10) or a stacked-layer grid axis.
    if carry_dtype is not None:
        hidden = hidden.astype(carry_dtype)   # bf16 carry halves activation DMA/VMEM
    for p in layer_params:
        hidden = bert_layer_pallas(hidden, mask_add, p, num_heads=num_heads,
                                   **layer_kwargs)
    return hidden  # last_hidden_state


# --------------------------- pure-JAX reference ----------------------------------

def _bert_layer_ref(x, mask_add, p, num_heads, ln_eps=1e-12):
    B, S, H = x.shape
    hd = H // num_heads

    def ln(y, g, b):
        mu = jnp.mean(y, -1, keepdims=True)
        var = jnp.mean((y - mu) ** 2, -1, keepdims=True)
        return (y - mu) * lax.rsqrt(var + ln_eps) * g + b

    q = x @ p["wq"] + p["bq"]
    k = x @ p["wk"] + p["bk"]
    v = x @ p["wv"] + p["bv"]
    q = q.reshape(B, S, num_heads, hd).transpose(0, 2, 1, 3)
    k = k.reshape(B, S, num_heads, hd).transpose(0, 2, 1, 3)
    v = v.reshape(B, S, num_heads, hd).transpose(0, 2, 1, 3)
    scores = jnp.einsum("bhqd,bhkd->bhqk", q, k) / math.sqrt(hd)
    scores = scores + mask_add[:, None, :, :]             # (B,1,1,S) broadcast
    probs = jax.nn.softmax(scores, axis=-1)
    ctx = jnp.einsum("bhqk,bhkd->bhqd", probs, v).transpose(0, 2, 1, 3).reshape(B, S, H)
    attn_out = ctx @ p["wo"] + p["bo"]
    h1 = ln(attn_out + x, p["ln1_g"], p["ln1_b"])
    inter = jax.nn.gelu(h1 @ p["wi"] + p["bi"], approximate=False)
    ffo = inter @ p["wd"] + p["bd"]
    return ln(ffo + h1, p["ln2_g"], p["ln2_b"])


def _bert_encoder_ref(x, mask_add, layer_params, num_heads):
    for p in layer_params:
        x = _bert_layer_ref(x, mask_add, p, num_heads)
    return x


# --------------------------------- main -------------------------------------------

def _init_layer_params(key, H, I):
    ks = jax.random.split(key, 6)
    n = lambda k, shape: (0.02 * jax.random.normal(k, shape)).astype(jnp.float32)
    return {
        "wq": n(ks[0], (H, H)), "bq": jnp.zeros((1, H), jnp.float32),
        "wk": n(ks[1], (H, H)), "bk": jnp.zeros((1, H), jnp.float32),
        "wv": n(ks[2], (H, H)), "bv": jnp.zeros((1, H), jnp.float32),
        "wo": n(ks[3], (H, H)), "bo": jnp.zeros((1, H), jnp.float32),
        "ln1_g": jnp.ones((1, H), jnp.float32), "ln1_b": jnp.zeros((1, H), jnp.float32),
        "wi": n(ks[4], (H, I)), "bi": jnp.zeros((1, I), jnp.float32),
        "wd": n(ks[5], (I, H)), "bd": jnp.zeros((1, H), jnp.float32),
        "ln2_g": jnp.ones((1, H), jnp.float32), "ln2_b": jnp.zeros((1, H), jnp.float32),
    }


if __name__ == "__main__":
    B, S, H = 2, 8, 32
    NUM_HEADS, INTERMEDIATE, NUM_LAYERS = 4, 64, 2

    key = jax.random.PRNGKey(0)
    keys = jax.random.split(key, 4 + NUM_LAYERS)

    hidden = jax.random.normal(keys[0], (B, S, H), dtype=jnp.float32)
    # binary attention mask -> HF-style additive extended mask (B, 1, S)
    attn_mask = jnp.ones((B, S), dtype=jnp.float32).at[1, S - 2:].set(0.0)
    mask_add = ((1.0 - attn_mask) * -10000.0)[:, None, :]
    layer_params = [_init_layer_params(keys[2 + i], H, INTERMEDIATE)
                    for i in range(NUM_LAYERS)]

    # --- (1) whole-sequence tile (nq == 1), f32 inter-layer carry ---
    out = jax.block_until_ready(
        bert_encoder_pallas(hidden, mask_add, layer_params, num_heads=NUM_HEADS))
    ref = _bert_encoder_ref(hidden, mask_add, layer_params, NUM_HEADS)
    assert out.shape == (B, S, H)
    # bf16 matmul operands + approx reciprocal -> looser tolerance vs f32 reference
    assert jnp.allclose(out, ref, rtol=1e-2, atol=1e-2), "mismatch (f32 carry)"

    # --- (2) bf16 inter-layer carry (halved activation traffic / VMEM) ---
    out_bf = jax.block_until_ready(
        bert_encoder_pallas(hidden, mask_add, layer_params, num_heads=NUM_HEADS,
                            carry_dtype=jnp.bfloat16))
    assert jnp.allclose(out_bf.astype(jnp.float32), ref, rtol=5e-2, atol=5e-2), \
        "mismatch (bf16 carry)"

    # --- (3) sequence-tiled queries (nq == 2): exercises the persistent K/V scratch ---
    B2, S2 = 1, 16
    hidden2 = jax.random.normal(keys[1], (B2, S2, H), dtype=jnp.float32)
    attn_mask2 = jnp.ones((B2, S2), dtype=jnp.float32).at[0, S2 - 3:].set(0.0)
    mask_add2 = ((1.0 - attn_mask2) * -10000.0)[:, None, :]
    out2 = jax.block_until_ready(
        bert_layer_pallas(hidden2, mask_add2, layer_params[0],
                          num_heads=NUM_HEADS, seq_tile=8))
    ref2 = _bert_layer_ref(hidden2, mask_add2, layer_params[0], NUM_HEADS)
    assert jnp.allclose(out2, ref2, rtol=1e-2, atol=1e-2), "mismatch (nq=2 / KV scratch)"

    print("KERNEL_OK")
</pallas_src>

<mosaic_0001>
module attributes {stable_mosaic.version = 11 : i64} {
  func.func @_bert_layer_kernel(%arg0: i32, %arg1: i32, %arg2: memref<1x8x32xf32, #tpu.memory_space<vmem>>, %arg3: memref<1x1x8xf32, #tpu.memory_space<vmem>>, %arg4: memref<32x32xbf16, #tpu.memory_space<vmem>>, %arg5: memref<1x32xf32, #tpu.memory_space<vmem>>, %arg6: memref<32x32xbf16, #tpu.memory_space<vmem>>, %arg7: memref<1x32xf32, #tpu.memory_space<vmem>>, %arg8: memref<32x32xbf16, #tpu.memory_space<vmem>>, %arg9: memref<1x32xf32, #tpu.memory_space<vmem>>, %arg10: memref<32x32xbf16, #tpu.memory_space<vmem>>, %arg11: memref<1x32xf32, #tpu.memory_space<vmem>>, %arg12: memref<1x32xf32, #tpu.memory_space<vmem>>, %arg13: memref<1x32xf32, #tpu.memory_space<vmem>>, %arg14: memref<32x64xbf16, #tpu.memory_space<vmem>>, %arg15: memref<1x64xf32, #tpu.memory_space<vmem>>, %arg16: memref<64x32xbf16, #tpu.memory_space<vmem>>, %arg17: memref<1x32xf32, #tpu.memory_space<vmem>>, %arg18: memref<1x32xf32, #tpu.memory_space<vmem>>, %arg19: memref<1x32xf32, #tpu.memory_space<vmem>>, %arg20: memref<1x8x32xf32, #tpu.memory_space<vmem>>, %arg21: memref<2x8x32xbf16, #tpu.memory_space<vmem>>, %arg22: memref<8x32xbf16, #tpu.memory_space<vmem>>) attributes {dimension_semantics = [#tpu.dimension_semantics<parallel>, #tpu.dimension_semantics<parallel>], iteration_bounds = array<i64: 2, 1>, scalar_prefetch = 0 : i64, scratch_operands = 2 : i64, tpu.core_type = #tpu.core_type<tc>, window_params = [{transform_indices = @transform_0, window_bounds = array<i64: 1, 8, 32>}, {transform_indices = @transform_1, window_bounds = array<i64: 1, 1, 8>}, {pipeline_mode = #tpu.pipeline_mode<synchronous>, transform_indices = @transform_2, window_bounds = array<i64: 32, 32>}, {pipeline_mode = #tpu.pipeline_mode<synchronous>, transform_indices = @transform_3, window_bounds = array<i64: 1, 32>}, {pipeline_mode = #tpu.pipeline_mode<synchronous>, transform_indices = @transform_4, window_bounds = array<i64: 32, 32>}, {pipeline_mode = #tpu.pipeline_mode<synchronous>, transform_indices = @transform_5, window_bounds = array<i64: 1, 32>}, {pipeline_mode = #tpu.pipeline_mode<synchronous>, transform_indices = @transform_6, window_bounds = array<i64: 32, 32>}, {pipeline_mode = #tpu.pipeline_mode<synchronous>, transform_indices = @transform_7, window_bounds = array<i64: 1, 32>}, {pipeline_mode = #tpu.pipeline_mode<synchronous>, transform_indices = @transform_8, window_bounds = array<i64: 32, 32>}, {pipeline_mode = #tpu.pipeline_mode<synchronous>, transform_indices = @transform_9, window_bounds = array<i64: 1, 32>}, {pipeline_mode = #tpu.pipeline_mode<synchronous>, transform_indices = @transform_10, window_bounds = array<i64: 1, 32>}, {pipeline_mode = #tpu.pipeline_mode<synchronous>, transform_indices = @transform_11, window_bounds = array<i64: 1, 32>}, {pipeline_mode = #tpu.pipeline_mode<synchronous>, transform_indices = @transform_12, window_bounds = array<i64: 32, 64>}, {pipeline_mode = #tpu.pipeline_mode<synchronous>, transform_indices = @transform_13, window_bounds = array<i64: 1, 64>}, {pipeline_mode = #tpu.pipeline_mode<synchronous>, transform_indices = @transform_14, window_bounds = array<i64: 64, 32>}, {pipeline_mode = #tpu.pipeline_mode<synchronous>, transform_indices = @transform_15, window_bounds = array<i64: 1, 32>}, {pipeline_mode = #tpu.pipeline_mode<synchronous>, transform_indices = @transform_16, window_bounds = array<i64: 1, 32>}, {pipeline_mode = #tpu.pipeline_mode<synchronous>, transform_indices = @transform_17, window_bounds = array<i64: 1, 32>}, {transform_indices = @transform_18, window_bounds = array<i64: 1, 8, 32>}]} {
    %c0 = arith.constant 0 : index
    %c0_0 = arith.constant 0 : index
    %c0_1 = arith.constant 0 : index
    %0 = vector.load %arg3[%c0, %c0_0, %c0_1] : memref<1x1x8xf32, #tpu.memory_space<vmem>>, vector<1x1x8xf32>
    %1 = vector.shape_cast %0 : vector<1x1x8xf32> to vector<1x8xf32>
    %c0_i32 = arith.constant 0 : i32
    %2 = arith.cmpi eq, %arg1, %c0_i32 : i32
    %3 = arith.extui %2 : i1 to i32
    %c0_i32_2 = arith.constant 0 : i32
    %4 = arith.cmpi ne, %3, %c0_i32_2 : i32
    scf.if %4 {
      %c0_80 = arith.constant 0 : index
      %c0_81 = arith.constant 0 : index
      %c0_82 = arith.constant 0 : index
      %184 = vector.load %arg2[%c0_80, %c0_81, %c0_82] : memref<1x8x32xf32, #tpu.memory_space<vmem>>, vector<1x8x32xf32>
      %185 = vector.shape_cast %184 : vector<1x8x32xf32> to vector<8x32xf32>
      %186 = arith.truncf %185 : vector<8x32xf32> to vector<8x32xbf16>
      %c0_83 = arith.constant 0 : index
      %c0_84 = arith.constant 0 : index
      %187 = vector.load %arg6[%c0_83, %c0_84] : memref<32x32xbf16, #tpu.memory_space<vmem>>, vector<32x32xbf16>
      %cst_85 = arith.constant dense<0.000000e+00> : vector<8x32xf32>
      %188 = tpu.matmul %186, %187, %cst_85 {dimension_numbers = #tpu.dot_dimension_numbers<[1], [0], [0], [1], [0, 0, 1, 1], [], []>} : vector<8x32xbf16>, vector<32x32xbf16>, vector<8x32xf32> -> vector<8x32xf32>
      %c0_86 = arith.constant 0 : index
      %c0_87 = arith.constant 0 : index
      %189 = vector.load %arg7[%c0_86, %c0_87] : memref<1x32xf32, #tpu.memory_space<vmem>>, vector<1x32xf32>
      %190 = vector.broadcast %189 : vector<1x32xf32> to vector<8x32xf32>
      %191 = arith.addf %188, %190 : vector<8x32xf32>
      %c0_88 = arith.constant 0 : index
      %c0_89 = arith.constant 0 : index
      %192 = vector.load %arg8[%c0_88, %c0_89] : memref<32x32xbf16, #tpu.memory_space<vmem>>, vector<32x32xbf16>
      %cst_90 = arith.constant dense<0.000000e+00> : vector<8x32xf32>
      %193 = tpu.matmul %186, %192, %cst_90 {dimension_numbers = #tpu.dot_dimension_numbers<[1], [0], [0], [1], [0, 0, 1, 1], [], []>} : vector<8x32xbf16>, vector<32x32xbf16>, vector<8x32xf32> -> vector<8x32xf32>
      %c0_91 = arith.constant 0 : index
      %c0_92 = arith.constant 0 : index
      %194 = vector.load %arg9[%c0_91, %c0_92] : memref<1x32xf32, #tpu.memory_space<vmem>>, vector<1x32xf32>
      %195 = vector.broadcast %194 : vector<1x32xf32> to vector<8x32xf32>
      %196 = arith.addf %193, %195 : vector<8x32xf32>
      %197 = arith.truncf %191 : vector<8x32xf32> to vector<8x32xbf16>
      %c0_93 = arith.constant 0 : index
      %c0_94 = arith.constant 0 : index
      %c0_95 = arith.constant 0 : index
      %198 = vector.load %arg21[%c0_93, %c0_94, %c0_95] : memref<2x8x32xbf16, #tpu.memory_space<vmem>>, vector<1x8x32xbf16>
      %199 = vector.shape_cast %198 : vector<1x8x32xbf16> to vector<8x32xbf16>
      %200 = vector.shape_cast %197 : vector<8x32xbf16> to vector<1x8x32xbf16>
      tpu.vector_store %arg21[%c0_93, %c0_94, %c0_95], %200 {strides = array<i32>} : memref<2x8x32xbf16, #tpu.memory_space<vmem>>, vector<1x8x32xbf16>,
      %201 = arith.truncf %196 : vector<8x32xf32> to vector<8x32xbf16>
      %c1_96 = arith.constant 1 : index
      %c0_97 = arith.constant 0 : index
      %c0_98 = arith.constant 0 : index
      %202 = vector.load %arg21[%c1_96, %c0_97, %c0_98] : memref<2x8x32xbf16, #tpu.memory_space<vmem>>, vector<1x8x32xbf16>
      %203 = vector.shape_cast %202 : vector<1x8x32xbf16> to vector<8x32xbf16>
      %204 = vector.shape_cast %201 : vector<8x32xbf16> to vector<1x8x32xbf16>
      tpu.vector_store %arg21[%c1_96, %c0_97, %c0_98], %204 {strides = array<i32>} : memref<2x8x32xbf16, #tpu.memory_space<vmem>>, vector<1x8x32xbf16>,
    } else {
    }
    %c8_i32 = arith.constant 8 : i32
    %5 = arith.muli %arg1, %c8_i32 : i32
    %6 = tpu.assume_multiple %5, 8 : i32
    %c0_3 = arith.constant 0 : index
    %7 = arith.index_cast %6 : i32 to index
    %c0_4 = arith.constant 0 : index
    %8 = vector.load %arg2[%c0_3, %7, %c0_4] : memref<1x8x32xf32, #tpu.memory_space<vmem>>, vector<1x8x32xf32>
    %9 = vector.shape_cast %8 : vector<1x8x32xf32> to vector<8x32xf32>
    %10 = arith.truncf %9 : vector<8x32xf32> to vector<8x32xbf16>
    %c0_5 = arith.constant 0 : index
    %c0_6 = arith.constant 0 : index
    %11 = vector.load %arg4[%c0_5, %c0_6] : memref<32x32xbf16, #tpu.memory_space<vmem>>, vector<32x32xbf16>
    %cst = arith.constant dense<0.000000e+00> : vector<8x32xf32>
    %12 = tpu.matmul %10, %11, %cst {dimension_numbers = #tpu.dot_dimension_numbers<[1], [0], [0], [1], [0, 0, 1, 1], [], []>} : vector<8x32xbf16>, vector<32x32xbf16>, vector<8x32xf32> -> vector<8x32xf32>
    %c0_7 = arith.constant 0 : index
    %c0_8 = arith.constant 0 : index
    %13 = vector.load %arg5[%c0_7, %c0_8] : memref<1x32xf32, #tpu.memory_space<vmem>>, vector<1x32xf32>
    %14 = vector.broadcast %13 : vector<1x32xf32> to vector<8x32xf32>
    %15 = arith.addf %12, %14 : vector<8x32xf32>
    %16 = arith.truncf %15 : vector<8x32xf32> to vector<8x32xbf16>
    %c0_9 = arith.constant 0 : index
    %c0_10 = arith.constant 0 : index
    %c0_11 = arith.constant 0 : index
    %17 = vector.load %arg21[%c0_9, %c0_10, %c0_11] : memref<2x8x32xbf16, #tpu.memory_space<vmem>>, vector<1x8x32xbf16>
    %18 = vector.shape_cast %17 : vector<1x8x32xbf16> to vector<8x32xbf16>
    %c1 = arith.constant 1 : index
    %c0_12 = arith.constant 0 : index
    %c0_13 = arith.constant 0 : index
    %19 = vector.load %arg21[%c1, %c0_12, %c0_13] : memref<2x8x32xbf16, #tpu.memory_space<vmem>>, vector<1x8x32xbf16>
    %20 = vector.shape_cast %19 : vector<1x8x32xbf16> to vector<8x32xbf16>
    %21 = vector.extract_strided_slice %16 {offsets = [0, 0], sizes = [8, 8], strides = [1, 1]} : vector<8x32xbf16> to vector<8x8xbf16>
    %22 = vector.extract_strided_slice %18 {offsets = [0, 0], sizes = [8, 8], strides = [1, 1]} : vector<8x32xbf16> to vector<8x8xbf16>
    %cst_14 = arith.constant dense<0.000000e+00> : vector<8x8xf32>
    %23 = tpu.matmul %21, %22, %cst_14 {dimension_numbers = #tpu.dot_dimension_numbers<[1], [1], [0], [0], [0, 0, 1, 0], [], []>} : vector<8x8xbf16>, vector<8x8xbf16>, vector<8x8xf32> -> vector<8x8xf32>
    %cst_15 = arith.constant 0.353553385 : f32
    %24 = vector.broadcast %cst_15 : f32 to vector<8x8xf32>
    %25 = arith.mulf %23, %24 : vector<8x8xf32>
    %26 = vector.broadcast %1 : vector<1x8xf32> to vector<8x8xf32>
    %27 = arith.addf %25, %26 : vector<8x8xf32>
    %cst_16 = arith.constant dense<0xFF800000> : vector<8xf32>
    %28 = vector.multi_reduction <maximumf>, %27, %cst_16 [1] : vector<8x8xf32> to vector<8xf32>
    %29 = vector.shape_cast %28 : vector<8xf32> to vector<8x1xf32>
    %30 = vector.broadcast %29 : vector<8x1xf32> to vector<8x8xf32>
    %31 = arith.subf %27, %30 : vector<8x8xf32>
    %32 = math.exp %31 : vector<8x8xf32>
    %cst_17 = arith.constant dense<0.000000e+00> : vector<8xf32>
    %33 = vector.multi_reduction <add>, %32, %cst_17 [1] : vector<8x8xf32> to vector<8xf32>
    %34 = vector.shape_cast %33 : vector<8xf32> to vector<8x1xf32>
    %35 = tpu.reciprocal %34 {approx = true} : vector<8x1xf32> -> vector<8x1xf32>
    %36 = vector.broadcast %35 : vector<8x1xf32> to vector<8x8xf32>
    %37 = arith.mulf %32, %36 : vector<8x8xf32>
    %38 = arith.truncf %37 : vector<8x8xf32> to vector<8x8xbf16>
    %39 = vector.extract_strided_slice %20 {offsets = [0, 0], sizes = [8, 8], strides = [1, 1]} : vector<8x32xbf16> to vector<8x8xbf16>
    %cst_18 = arith.constant dense<0.000000e+00> : vector<8x8xf32>
    %40 = tpu.matmul %38, %39, %cst_18 {dimension_numbers = #tpu.dot_dimension_numbers<[1], [0], [0], [1], [0, 0, 1, 1], [], []>} : vector<8x8xbf16>, vector<8x8xbf16>, vector<8x8xf32> -> vector<8x8xf32>
    %41 = arith.truncf %40 : vector<8x8xf32> to vector<8x8xbf16>
    %c0_19 = arith.constant 0 : index
    %c0_20 = arith.constant 0 : index
    %42 = vector.load %arg22[%c0_19, %c0_20] : memref<8x32xbf16, #tpu.memory_space<vmem>>, vector<8x8xbf16>
    tpu.vector_store %arg22[%c0_19, %c0_20], %41 {strides = array<i32>} : memref<8x32xbf16, #tpu.memory_space<vmem>>, vector<8x8xbf16>,
    %43 = vector.extract_strided_slice %16 {offsets = [0, 8], sizes = [8, 8], strides = [1, 1]} : vector<8x32xbf16> to vector<8x8xbf16>
    %44 = vector.extract_strided_slice %18 {offsets = [0, 8], sizes = [8, 8], strides = [1, 1]} : vector<8x32xbf16> to vector<8x8xbf16>
    %cst_21 = arith.constant dense<0.000000e+00> : vector<8x8xf32>
    %45 = tpu.matmul %43, %44, %cst_21 {dimension_numbers = #tpu.dot_dimension_numbers<[1], [1], [0], [0], [0, 0, 1, 0], [], []>} : vector<8x8xbf16>, vector<8x8xbf16>, vector<8x8xf32> -> vector<8x8xf32>
    %cst_22 = arith.constant 0.353553385 : f32
    %46 = vector.broadcast %cst_22 : f32 to vector<8x8xf32>
    %47 = arith.mulf %45, %46 : vector<8x8xf32>
    %48 = vector.broadcast %1 : vector<1x8xf32> to vector<8x8xf32>
    %49 = arith.addf %47, %48 : vector<8x8xf32>
    %cst_23 = arith.constant dense<0xFF800000> : vector<8xf32>
    %50 = vector.multi_reduction <maximumf>, %49, %cst_23 [1] : vector<8x8xf32> to vector<8xf32>
    %51 = vector.shape_cast %50 : vector<8xf32> to vector<8x1xf32>
    %52 = vector.broadcast %51 : vector<8x1xf32> to vector<8x8xf32>
    %53 = arith.subf %49, %52 : vector<8x8xf32>
    %54 = math.exp %53 : vector<8x8xf32>
    %cst_24 = arith.constant dense<0.000000e+00> : vector<8xf32>
    %55 = vector.multi_reduction <add>, %54, %cst_24 [1] : vector<8x8xf32> to vector<8xf32>
    %56 = vector.shape_cast %55 : vector<8xf32> to vector<8x1xf32>
    %57 = tpu.reciprocal %56 {approx = true} : vector<8x1xf32> -> vector<8x1xf32>
    %58 = vector.broadcast %57 : vector<8x1xf32> to vector<8x8xf32>
    %59 = arith.mulf %54, %58 : vector<8x8xf32>
    %60 = arith.truncf %59 : vector<8x8xf32> to vector<8x8xbf16>
    %61 = vector.extract_strided_slice %20 {offsets = [0, 8], sizes = [8, 8], strides = [1, 1]} : vector<8x32xbf16> to vector<8x8xbf16>
    %cst_25 = arith.constant dense<0.000000e+00> : vector<8x8xf32>
    %62 = tpu.matmul %60, %61, %cst_25 {dimension_numbers = #tpu.dot_dimension_numbers<[1], [0], [0], [1], [0, 0, 1, 1], [], []>} : vector<8x8xbf16>, vector<8x8xbf16>, vector<8x8xf32> -> vector<8x8xf32>
    %63 = arith.truncf %62 : vector<8x8xf32> to vector<8x8xbf16>
    %c0_26 = arith.constant 0 : index
    %c8 = arith.constant 8 : index
    %64 = vector.load %arg22[%c0_26, %c8] : memref<8x32xbf16, #tpu.memory_space<vmem>>, vector<8x8xbf16>
    tpu.vector_store %arg22[%c0_26, %c8], %63 {strides = array<i32>} : memref<8x32xbf16, #tpu.memory_space<vmem>>, vector<8x8xbf16>,
    %65 = vector.extract_strided_slice %16 {offsets = [0, 16], sizes = [8, 8], strides = [1, 1]} : vector<8x32xbf16> to vector<8x8xbf16>
    %66 = vector.extract_strided_slice %18 {offsets = [0, 16], sizes = [8, 8], strides = [1, 1]} : vector<8x32xbf16> to vector<8x8xbf16>
    %cst_27 = arith.constant dense<0.000000e+00> : vector<8x8xf32>
    %67 = tpu.matmul %65, %66, %cst_27 {dimension_numbers = #tpu.dot_dimension_numbers<[1], [1], [0], [0], [0, 0, 1, 0], [], []>} : vector<8x8xbf16>, vector<8x8xbf16>, vector<8x8xf32> -> vector<8x8xf32>
    %cst_28 = arith.constant 0.353553385 : f32
    %68 = vector.broadcast %cst_28 : f32 to vector<8x8xf32>
    %69 = arith.mulf %67, %68 : vector<8x8xf32>
    %70 = vector.broadcast %1 : vector<1x8xf32> to vector<8x8xf32>
    %71 = arith.addf %69, %70 : vector<8x8xf32>
    %cst_29 = arith.constant dense<0xFF800000> : vector<8xf32>
    %72 = vector.multi_reduction <maximumf>, %71, %cst_29 [1] : vector<8x8xf32> to vector<8xf32>
    %73 = vector.shape_cast %72 : vector<8xf32> to vector<8x1xf32>
    %74 = vector.broadcast %73 : vector<8x1xf32> to vector<8x8xf32>
    %75 = arith.subf %71, %74 : vector<8x8xf32>
    %76 = math.exp %75 : vector<8x8xf32>
    %cst_30 = arith.constant dense<0.000000e+00> : vector<8xf32>
    %77 = vector.multi_reduction <add>, %76, %cst_30 [1] : vector<8x8xf32> to vector<8xf32>
    %78 = vector.shape_cast %77 : vector<8xf32> to vector<8x1xf32>
    %79 = tpu.reciprocal %78 {approx = true} : vector<8x1xf32> -> vector<8x1xf32>
    %80 = vector.broadcast %79 : vector<8x1xf32> to vector<8x8xf32>
    %81 = arith.mulf %76, %80 : vector<8x8xf32>
    %82 = arith.truncf %81 : vector<8x8xf32> to vector<8x8xbf16>
    %83 = vector.extract_strided_slice %20 {offsets = [0, 16], sizes = [8, 8], strides = [1, 1]} : vector<8x32xbf16> to vector<8x8xbf16>
    %cst_31 = arith.constant dense<0.000000e+00> : vector<8x8xf32>
    %84 = tpu.matmul %82, %83, %cst_31 {dimension_numbers = #tpu.dot_dimension_numbers<[1], [0], [0], [1], [0, 0, 1, 1], [], []>} : vector<8x8xbf16>, vector<8x8xbf16>, vector<8x8xf32> -> vector<8x8xf32>
    %85 = arith.truncf %84 : vector<8x8xf32> to vector<8x8xbf16>
    %c0_32 = arith.constant 0 : index
    %c16 = arith.constant 16 : index
    %86 = vector.load %arg22[%c0_32, %c16] : memref<8x32xbf16, #tpu.memory_space<vmem>>, vector<8x8xbf16>
    tpu.vector_store %arg22[%c0_32, %c16], %85 {strides = array<i32>} : memref<8x32xbf16, #tpu.memory_space<vmem>>, vector<8x8xbf16>,
    %87 = vector.extract_strided_slice %16 {offsets = [0, 24], sizes = [8, 8], strides = [1, 1]} : vector<8x32xbf16> to vector<8x8xbf16>
    %88 = vector.extract_strided_slice %18 {offsets = [0, 24], sizes = [8, 8], strides = [1, 1]} : vector<8x32xbf16> to vector<8x8xbf16>
    %cst_33 = arith.constant dense<0.000000e+00> : vector<8x8xf32>
    %89 = tpu.matmul %87, %88, %cst_33 {dimension_numbers = #tpu.dot_dimension_numbers<[1], [1], [0], [0], [0, 0, 1, 0], [], []>} : vector<8x8xbf16>, vector<8x8xbf16>, vector<8x8xf32> -> vector<8x8xf32>
    %cst_34 = arith.constant 0.353553385 : f32
    %90 = vector.broadcast %cst_34 : f32 to vector<8x8xf32>
    %91 = arith.mulf %89, %90 : vector<8x8xf32>
    %92 = vector.broadcast %1 : vector<1x8xf32> to vector<8x8xf32>
    %93 = arith.addf %91, %92 : vector<8x8xf32>
    %cst_35 = arith.constant dense<0xFF800000> : vector<8xf32>
    %94 = vector.multi_reduction <maximumf>, %93, %cst_35 [1] : vector<8x8xf32> to vector<8xf32>
    %95 = vector.shape_cast %94 : vector<8xf32> to vector<8x1xf32>
    %96 = vector.broadcast %95 : vector<8x1xf32> to vector<8x8xf32>
    %97 = arith.subf %93, %96 : vector<8x8xf32>
    %98 = math.exp %97 : vector<8x8xf32>
    %cst_36 = arith.constant dense<0.000000e+00> : vector<8xf32>
    %99 = vector.multi_reduction <add>, %98, %cst_36 [1] : vector<8x8xf32> to vector<8xf32>
    %100 = vector.shape_cast %99 : vector<8xf32> to vector<8x1xf32>
    %101 = tpu.reciprocal %100 {approx = true} : vector<8x1xf32> -> vector<8x1xf32>
    %102 = vector.broadcast %101 : vector<8x1xf32> to vector<8x8xf32>
    %103 = arith.mulf %98, %102 : vector<8x8xf32>
    %104 = arith.truncf %103 : vector<8x8xf32> to vector<8x8xbf16>
    %105 = vector.extract_strided_slice %20 {offsets = [0, 24], sizes = [8, 8], strides = [1, 1]} : vector<8x32xbf16> to vector<8x8xbf16>
    %cst_37 = arith.constant dense<0.000000e+00> : vector<8x8xf32>
    %106 = tpu.matmul %104, %105, %cst_37 {dimension_numbers = #tpu.dot_dimension_numbers<[1], [0], [0], [1], [0, 0, 1, 1], [], []>} : vector<8x8xbf16>, vector<8x8xbf16>, vector<8x8xf32> -> vector<8x8xf32>
    %107 = arith.truncf %106 : vector<8x8xf32> to vector<8x8xbf16>
    %c0_38 = arith.constant 0 : index
    %c24 = arith.constant 24 : index
    %108 = vector.load %arg22[%c0_38, %c24] : memref<8x32xbf16, #tpu.memory_space<vmem>>, vector<8x8xbf16>
    tpu.vector_store %arg22[%c0_38, %c24], %107 {strides = array<i32>} : memref<8x32xbf16, #tpu.memory_space<vmem>>, vector<8x8xbf16>,
    %c0_39 = arith.constant 0 : index
    %c0_40 = arith.constant 0 : index
    %109 = vector.load %arg22[%c0_39, %c0_40] : memref<8x32xbf16, #tpu.memory_space<vmem>>, vector<8x32xbf16>
    %c0_41 = arith.constant 0 : index
    %c0_42 = arith.constant 0 : index
    %110 = vector.load %arg10[%c0_41, %c0_42] : memref<32x32xbf16, #tpu.memory_space<vmem>>, vector<32x32xbf16>
    %cst_43 = arith.constant dense<0.000000e+00> : vector<8x32xf32>
    %111 = tpu.matmul %109, %110, %cst_43 {dimension_numbers = #tpu.dot_dimension_numbers<[1], [0], [0], [1], [0, 0, 1, 1], [], []>} : vector<8x32xbf16>, vector<32x32xbf16>, vector<8x32xf32> -> vector<8x32xf32>
    %c0_44 = arith.constant 0 : index
    %c0_45 = arith.constant 0 : index
    %112 = vector.load %arg11[%c0_44, %c0_45] : memref<1x32xf32, #tpu.memory_space<vmem>>, vector<1x32xf32>
    %113 = vector.broadcast %112 : vector<1x32xf32> to vector<8x32xf32>
    %114 = arith.addf %111, %113 : vector<8x32xf32>
    %115 = arith.addf %114, %9 : vector<8x32xf32>
    %c0_46 = arith.constant 0 : index
    %c0_47 = arith.constant 0 : index
    %116 = vector.load %arg12[%c0_46, %c0_47] : memref<1x32xf32, #tpu.memory_space<vmem>>, vector<1x32xf32>
    %c0_48 = arith.constant 0 : index
    %c0_49 = arith.constant 0 : index
    %117 = vector.load %arg13[%c0_48, %c0_49] : memref<1x32xf32, #tpu.memory_space<vmem>>, vector<1x32xf32>
    %cst_50 = arith.constant dense<0.000000e+00> : vector<8xf32>
    %118 = vector.multi_reduction <add>, %115, %cst_50 [1] : vector<8x32xf32> to vector<8xf32>
    %119 = vector.shape_cast %118 : vector<8xf32> to vector<8x1xf32>
    %cst_51 = arith.constant 3.200000e+01 : f32
    %120 = vector.broadcast %cst_51 : f32 to vector<8x1xf32>
    %121 = arith.divf %119, %120 : vector<8x1xf32>
    %122 = vector.broadcast %121 : vector<8x1xf32> to vector<8x32xf32>
    %123 = arith.subf %115, %122 : vector<8x32xf32>
    %124 = arith.mulf %123, %123 : vector<8x32xf32>
    %cst_52 = arith.constant dense<0.000000e+00> : vector<8xf32>
    %125 = vector.multi_reduction <add>, %124, %cst_52 [1] : vector<8x32xf32> to vector<8xf32>
    %126 = vector.shape_cast %125 : vector<8xf32> to vector<8x1xf32>
    %cst_53 = arith.constant 3.200000e+01 : f32
    %127 = vector.broadcast %cst_53 : f32 to vector<8x1xf32>
    %128 = arith.divf %126, %127 : vector<8x1xf32>
    %cst_54 = arith.constant 9.99999996E-13 : f32
    %129 = vector.broadcast %cst_54 : f32 to vector<8x1xf32>
    %130 = arith.addf %128, %129 : vector<8x1xf32>
    %131 = math.rsqrt %130 : vector<8x1xf32>
    %132 = vector.broadcast %131 : vector<8x1xf32> to vector<8x32xf32>
    %133 = arith.mulf %123, %132 : vector<8x32xf32>
    %134 = vector.broadcast %116 : vector<1x32xf32> to vector<8x32xf32>
    %135 = arith.mulf %133, %134 : vector<8x32xf32>
    %136 = vector.broadcast %117 : vector<1x32xf32> to vector<8x32xf32>
    %137 = arith.addf %135, %136 : vector<8x32xf32>
    %138 = arith.truncf %137 : vector<8x32xf32> to vector<8x32xbf16>
    %c0_55 = arith.constant 0 : index
    %c0_56 = arith.constant 0 : index
    %139 = vector.load %arg14[%c0_55, %c0_56] : memref<32x64xbf16, #tpu.memory_space<vmem>>, vector<32x64xbf16>
    %cst_57 = arith.constant dense<0.000000e+00> : vector<8x64xf32>
    %140 = tpu.matmul %138, %139, %cst_57 {dimension_numbers = #tpu.dot_dimension_numbers<[1], [0], [0], [1], [0, 0, 1, 1], [], []>} : vector<8x32xbf16>, vector<32x64xbf16>, vector<8x64xf32> -> vector<8x64xf32>
    %c0_58 = arith.constant 0 : index
    %c0_59 = arith.constant 0 : index
    %141 = vector.load %arg15[%c0_58, %c0_59] : memref<1x64xf32, #tpu.memory_space<vmem>>, vector<1x64xf32>
    %142 = vector.broadcast %141 : vector<1x64xf32> to vector<8x64xf32>
    %143 = arith.addf %140, %142 : vector<8x64xf32>
    %cst_60 = arith.constant 5.000000e-01 : f32
    %144 = vector.broadcast %cst_60 : f32 to vector<8x64xf32>
    %145 = arith.mulf %144, %143 : vector<8x64xf32>
    %cst_61 = arith.constant 0.707106769 : f32
    %146 = vector.broadcast %cst_61 : f32 to vector<8x64xf32>
    %147 = arith.mulf %143, %146 : vector<8x64xf32>
    %148 = math.erf %147 : vector<8x64xf32>
    %cst_62 = arith.constant 1.000000e+00 : f32
    %149 = vector.broadcast %cst_62 : f32 to vector<8x64xf32>
    %150 = arith.addf %149, %148 : vector<8x64xf32>
    %151 = arith.mulf %145, %150 : vector<8x64xf32>
    %152 = arith.truncf %151 : vector<8x64xf32> to vector<8x64xbf16>
    %c0_63 = arith.constant 0 : index
    %c0_64 = arith.constant 0 : index
    %153 = vector.load %arg16[%c0_63, %c0_64] : memref<64x32xbf16, #tpu.memory_space<vmem>>, vector<64x32xbf16>
    %cst_65 = arith.constant dense<0.000000e+00> : vector<8x32xf32>
    %154 = tpu.matmul %152, %153, %cst_65 {dimension_numbers = #tpu.dot_dimension_numbers<[1], [0], [0], [1], [0, 0, 1, 1], [], []>} : vector<8x64xbf16>, vector<64x32xbf16>, vector<8x32xf32> -> vector<8x32xf32>
    %c0_66 = arith.constant 0 : index
    %c0_67 = arith.constant 0 : index
    %155 = vector.load %arg17[%c0_66, %c0_67] : memref<1x32xf32, #tpu.memory_space<vmem>>, vector<1x32xf32>
    %156 = vector.broadcast %155 : vector<1x32xf32> to vector<8x32xf32>
    %157 = arith.addf %154, %156 : vector<8x32xf32>
    %158 = arith.addf %157, %137 : vector<8x32xf32>
    %c0_68 = arith.constant 0 : index
    %c0_69 = arith.constant 0 : index
    %159 = vector.load %arg18[%c0_68, %c0_69] : memref<1x32xf32, #tpu.memory_space<vmem>>, vector<1x32xf32>
    %c0_70 = arith.constant 0 : index
    %c0_71 = arith.constant 0 : index
    %160 = vector.load %arg19[%c0_70, %c0_71] : memref<1x32xf32, #tpu.memory_space<vmem>>, vector<1x32xf32>
    %cst_72 = arith.constant dense<0.000000e+00> : vector<8xf32>
    %161 = vector.multi_reduction <add>, %158, %cst_72 [1] : vector<8x32xf32> to vector<8xf32>
    %162 = vector.shape_cast %161 : vector<8xf32> to vector<8x1xf32>
    %cst_73 = arith.constant 3.200000e+01 : f32
    %163 = vector.broadcast %cst_73 : f32 to vector<8x1xf32>
    %164 = arith.divf %162, %163 : vector<8x1xf32>
    %165 = vector.broadcast %164 : vector<8x1xf32> to vector<8x32xf32>
    %166 = arith.subf %158, %165 : vector<8x32xf32>
    %167 = arith.mulf %166, %166 : vector<8x32xf32>
    %cst_74 = arith.constant dense<0.000000e+00> : vector<8xf32>
    %168 = vector.multi_reduction <add>, %167, %cst_74 [1] : vector<8x32xf32> to vector<8xf32>
    %169 = vector.shape_cast %168 : vector<8xf32> to vector<8x1xf32>
    %cst_75 = arith.constant 3.200000e+01 : f32
    %170 = vector.broadcast %cst_75 : f32 to vector<8x1xf32>
    %171 = arith.divf %169, %170 : vector<8x1xf32>
    %cst_76 = arith.constant 9.99999996E-13 : f32
    %172 = vector.broadcast %cst_76 : f32 to vector<8x1xf32>
    %173 = arith.addf %171, %172 : vector<8x1xf32>
    %174 = math.rsqrt %173 : vector<8x1xf32>
    %175 = vector.broadcast %174 : vector<8x1xf32> to vector<8x32xf32>
    %176 = arith.mulf %166, %175 : vector<8x32xf32>
    %177 = vector.broadcast %159 : vector<1x32xf32> to vector<8x32xf32>
    %178 = arith.mulf %176, %177 : vector<8x32xf32>
    %179 = vector.broadcast %160 : vector<1x32xf32> to vector<8x32xf32>
    %180 = arith.addf %178, %179 : vector<8x32xf32>
    %c0_77 = arith.constant 0 : index
    %c0_78 = arith.constant 0 : index
    %c0_79 = arith.constant 0 : index
    %181 = vector.load %arg20[%c0_77, %c0_78, %c0_79] : memref<1x8x32xf32, #tpu.memory_space<vmem>>, vector<1x8x32xf32>
    %182 = vector.shape_cast %181 : vector<1x8x32xf32> to vector<8x32xf32>
    %183 = vector.shape_cast %180 : vector<8x32xf32> to vector<1x8x32xf32>
    tpu.vector_store %arg20[%c0_77, %c0_78, %c0_79], %183 {strides = array<i32>} : memref<1x8x32xf32, #tpu.memory_space<vmem>>, vector<1x8x32xf32>,
    return
  }
  func.func @transform_0(%arg0: i32, %arg1: i32) -> (i32, i32, i32) {
    %c0_i32 = arith.constant 0 : i32
    %c0_i32_0 = arith.constant 0 : i32
    %c0_i32_1 = arith.constant 0 : i32
    return %arg0, %c0_i32, %c0_i32_0 : i32, i32, i32
  }
  func.func @transform_1(%arg0: i32, %arg1: i32) -> (i32, i32, i32) {
    %c0_i32 = arith.constant 0 : i32
    %c0_i32_0 = arith.constant 0 : i32
    %c0_i32_1 = arith.constant 0 : i32
    return %arg0, %c0_i32, %c0_i32_0 : i32, i32, i32
  }
  func.func @transform_2(%arg0: i32, %arg1: i32) -> (i32, i32) {
    %c0_i32 = arith.constant 0 : i32
    %c0_i32_0 = arith.constant 0 : i32
    %c0_i32_1 = arith.constant 0 : i32
    return %c0_i32, %c0_i32_0 : i32, i32
  }
  func.func @transform_3(%arg0: i32, %arg1: i32) -> (i32, i32) {
    %c0_i32 = arith.constant 0 : i32
    %c0_i32_0 = arith.constant 0 : i32
    %c0_i32_1 = arith.constant 0 : i32
    return %c0_i32, %c0_i32_0 : i32, i32
  }
  func.func @transform_4(%arg0: i32, %arg1: i32) -> (i32, i32) {
    %c0_i32 = arith.constant 0 : i32
    %c0_i32_0 = arith.constant 0 : i32
    %c0_i32_1 = arith.constant 0 : i32
    return %c0_i32, %c0_i32_0 : i32, i32
  }
  func.func @transform_5(%arg0: i32, %arg1: i32) -> (i32, i32) {
    %c0_i32 = arith.constant 0 : i32
    %c0_i32_0 = arith.constant 0 : i32
    %c0_i32_1 = arith.constant 0 : i32
    return %c0_i32, %c0_i32_0 : i32, i32
  }
  func.func @transform_6(%arg0: i32, %arg1: i32) -> (i32, i32) {
    %c0_i32 = arith.constant 0 : i32
    %c0_i32_0 = arith.constant 0 : i32
    %c0_i32_1 = arith.constant 0 : i32
    return %c0_i32, %c0_i32_0 : i32, i32
  }
  func.func @transform_7(%arg0: i32, %arg1: i32) -> (i32, i32) {
    %c0_i32 = arith.constant 0 : i32
    %c0_i32_0 = arith.constant 0 : i32
    %c0_i32_1 = arith.constant 0 : i32
    return %c0_i32, %c0_i32_0 : i32, i32
  }
  func.func @transform_8(%arg0: i32, %arg1: i32) -> (i32, i32) {
    %c0_i32 = arith.constant 0 : i32
    %c0_i32_0 = arith.constant 0 : i32
    %c0_i32_1 = arith.constant 0 : i32
    return %c0_i32, %c0_i32_0 : i32, i32
  }
  func.func @transform_9(%arg0: i32, %arg1: i32) -> (i32, i32) {
    %c0_i32 = arith.constant 0 : i32
    %c0_i32_0 = arith.constant 0 : i32
    %c0_i32_1 = arith.constant 0 : i32
    return %c0_i32, %c0_i32_0 : i32, i32
  }
  func.func @transform_10(%arg0: i32, %arg1: i32) -> (i32, i32) {
    %c0_i32 = arith.constant 0 : i32
    %c0_i32_0 = arith.constant 0 : i32
    %c0_i32_1 = arith.constant 0 : i32
    return %c0_i32, %c0_i32_0 : i32, i32
  }
  func.func @transform_11(%arg0: i32, %arg1: i32) -> (i32, i32) {
    %c0_i32 = arith.constant 0 : i32
    %c0_i32_0 = arith.constant 0 : i32
    %c0_i32_1 = arith.constant 0 : i32
    return %c0_i32, %c0_i32_0 : i32, i32
  }
  func.func @transform_12(%arg0: i32, %arg1: i32) -> (i32, i32) {
    %c0_i32 = arith.constant 0 : i32
    %c0_i32_0 = arith.constant 0 : i32
    %c0_i32_1 = arith.constant 0 : i32
    return %c0_i32, %c0_i32_0 : i32, i32
  }
  func.func @transform_13(%arg0: i32, %arg1: i32) -> (i32, i32) {
    %c0_i32 = arith.constant 0 : i32
    %c0_i32_0 = arith.constant 0 : i32
    %c0_i32_1 = arith.constant 0 : i32
    return %c0_i32, %c0_i32_0 : i32, i32
  }
  func.func @transform_14(%arg0: i32, %arg1: i32) -> (i32, i32) {
    %c0_i32 = arith.constant 0 : i32
    %c0_i32_0 = arith.constant 0 : i32
    %c0_i32_1 = arith.constant 0 : i32
    return %c0_i32, %c0_i32_0 : i32, i32
  }
  func.func @transform_15(%arg0: i32, %arg1: i32) -> (i32, i32) {
    %c0_i32 = arith.constant 0 : i32
    %c0_i32_0 = arith.constant 0 : i32
    %c0_i32_1 = arith.constant 0 : i32
    return %c0_i32, %c0_i32_0 : i32, i32
  }
  func.func @transform_16(%arg0: i32, %arg1: i32) -> (i32, i32) {
    %c0_i32 = arith.constant 0 : i32
    %c0_i32_0 = arith.constant 0 : i32
    %c0_i32_1 = arith.constant 0 : i32
    return %c0_i32, %c0_i32_0 : i32, i32
  }
  func.func @transform_17(%arg0: i32, %arg1: i32) -> (i32, i32) {
    %c0_i32 = arith.constant 0 : i32
    %c0_i32_0 = arith.constant 0 : i32
    %c0_i32_1 = arith.constant 0 : i32
    return %c0_i32, %c0_i32_0 : i32, i32
  }
  func.func @transform_18(%arg0: i32, %arg1: i32) -> (i32, i32, i32) {
    %c0_i32 = arith.constant 0 : i32
    %c0_i32_0 = arith.constant 0 : i32
    return %arg0, %arg1, %c0_i32 : i32, i32, i32
  }
}

</mosaic_0001>

<bundles_post_ra>
// kernel: tpu_custom_call.1
= control target key start
LH: loop header
LB: loop body
LE: loop exit
PB: predicated region body
PF: predicated region fallthrough
CT: control target
= control target key end

     0   :  { %s4078_s0 = inlined_call_operand.hbm [shape: f32[2,8,32], index: 0, kind: input, shape index: {}]   ;;  %s4079_s1 = inlined_call_operand.hbm [shape: f32[2,1,8], index: 1, kind: input, shape index: {}]   ;;  %s4080_s2 = inlined_call_operand.hbm [shape: bf16[32,32], index: 2, kind: input, shape index: {}]   ;;  %s4081_s3 = inlined_call_operand.hbm [shape: f32[1,32], index: 3, kind: input, shape index: {}]   ;;  %s4082_s4 = inlined_call_operand.hbm [shape: bf16[32,32], index: 4, kind: input, shape index: {}]   ;;  %s4083_s5 = inlined_call_operand.hbm [shape: f32[1,32], index: 5, kind: input, shape index: {}]   ;;  %s4084_s6 = inlined_call_operand.hbm [shape: bf16[32,32], index: 6, kind: input, shape index: {}]   ;;  %s4085_s7 = inlined_call_operand.hbm [shape: f32[1,32], index: 7, kind: input, shape index: {}]   ;;  %s4086_s8 = inlined_call_operand.hbm [shape: bf16[32,32], index: 8, kind: input, shape index: {}]   ;;  %s4087_s9 = inlined_call_operand.hbm [shape: f32[1,32], index: 9, kind: input, shape index: {}]   ;;  %s4088_s10 = inlined_call_operand.hbm [shape: f32[1,32], index: 10, kind: input, shape index: {}]   ;;  %s4089_s11 = inlined_call_operand.hbm [shape: f32[1,32], index: 11, kind: input, shape index: {}]   ;;  %s4090_s12 = inlined_call_operand.hbm [shape: bf16[32,64], index: 12, kind: input, shape index: {}]   ;;  %s4091_s13 = inlined_call_operand.hbm [shape: f32[1,64], index: 13, kind: input, shape index: {}]   ;;  %s4092_s14 = inlined_call_operand.hbm [shape: bf16[64,32], index: 14, kind: input, shape index: {}]   ;;  %s4093_s15 = inlined_call_operand.hbm [shape: f32[1,32], index: 15, kind: input, shape index: {}]   ;;  %s4094_s16 = inlined_call_operand.hbm [shape: f32[1,32], index: 16, kind: input, shape index: {}]   ;;  %s4095_s17 = inlined_call_operand.hbm [shape: f32[1,32], index: 17, kind: input, shape index: {}]   ;;  %s4096_s18 = inlined_call_operand.hbm [shape: f32[2,8,32], index: 18, kind: output, shape index: {}]  }
   0x1   :  { %4119 = sst [smem:[#allocation54_spill]] %s4078_s0 }
   0x2   :  { %4120 = sst [smem:[#allocation55_spill]] %s4079_s1 }
   0x3   :  { %4121 = sst [smem:[#allocation56_spill]] %s4080_s2 }
   0x4   :  { %4122 = sst [smem:[#allocation57_spill]] %s4081_s3 }
   0x5   :  { %4123 = sst [smem:[#allocation58_spill]] %s4082_s4 }
   0x6   :  { %4124 = sst [smem:[#allocation59_spill]] %s4083_s5 }
   0x7   :  { %4125 = sst [smem:[#allocation60_spill]] %s4084_s6 }
   0x8   :  { %4126 = sst [smem:[#allocation61_spill]] %s4085_s7 }
   0x9   :  { %4127 = sst [smem:[#allocation62_spill]] %s4086_s8 }
   0xa   :  { %4128 = sst [smem:[#allocation63_spill]] %s4087_s9 }
   0xb   :  { %4129 = sst [smem:[#allocation64_spill]] %s4088_s10 }
   0xc   :  { %4130 = sst [smem:[#allocation65_spill]] %s4095_s17 }
   0xd   :  { %4131 = sst [smem:[#allocation66_spill]] %s4096_s18 }
   0xe   :  { %23 = vsyncpa [#allocation5], 0 }
   0xf   :  { %25 = vsyncpa [#allocation5 + $0x1], 0 }
  0x10   :  { %26 = vsyncpa [#allocation8], 0 }
  0x11   :  { %28 = vsyncpa [#allocation8 + $0x1], 0 }
  0x12   :  { %29 = vsyncpa [#allocation11], 0 }
  0x13   :  { %30 = vsyncpa [#allocation14], 0 }
  0x14   :  { %31 = vsyncpa [#allocation17], 0 }
  0x15   :  { %32 = vsyncpa [#allocation20], 0 }
  0x16   :  { %33 = vsyncpa [#allocation23], 0 }
  0x17   :  { %34 = vsyncpa [#allocation26], 0 }
  0x18   :  { %35 = vsyncpa [#allocation29], 0 }
  0x19   :  { %36 = vsyncpa [#allocation32], 0 }
  0x1a   :  { %37 = vsyncpa [#allocation6], 0 }
  0x1b   :  { %39 = vsyncpa [#allocation6 + $0x1], 0  ;;  %s3371_s27 = smov 0   ;;  %s3373_s28 = smov 0  }
  0x1c   :  { %s3375_s29 = smov 0   ;;  %s3377_s30 = smov 0  }
  0x1d   :  { %s3379_s0 = smov 0   ;;  %s3381_s19 = smov 0  }
  0x1e LB: > { %4132 = sst [smem:[#allocation46_spill]] %s3225_s27  ;;  %s3402_s1 = sadd.s32 4294967295, %s3245_s19   ;;  %s3245_s19 = sphi %s3381_s19, %s45_s19   ;;  %s3241_s0 = sphi %s3379_s0, %s4209_s0   ;;  %s3237_s30 = sphi %s3377_s30, %s4205_s30   ;;  %s3233_s29 = sphi %s3375_s29, %s4207_s29   ;;  %s3229_s28 = sphi %s3373_s28, %s4203_s28   ;;  %s3225_s27 = sphi %s3371_s27, %s4206_s27  }
  0x1f   : > { %4133 = sst [smem:[#allocation47_spill]] %s3229_s28  ;;  %p2112_p0 = scmp.ge.s32.totalorder %s3245_s19, 1 }
  0x20   : > { %4134 = sst [smem:[#allocation48_spill]] %s3233_s29  ;;  %p4112_p1 = scmp.eq.s32.totalorder %s3402_s1, 0 }
  0x21   : > { %4135 = sst [smem:[#allocation49_spill]] %s3237_s30  ;;  %p478_p2 = scmp.lt.s32.totalorder %s3245_s19, 3 }
  0x22   : > { %4136 = sst [smem:[#allocation50_spill]] %s3241_s0  ;;  %s3247_s21 = smov [#allocation9]  }
  0x23   : > { %4137 = sst [smem:[#allocation51_spill]] %s3245_s19  ;;  %p3407_p3 = pnand %p2112_p0, %p478_p2 }
  0x24   : > { %4138 = sst [smem:[#allocation52_spill]] %s3402_s1  ;;  %s490_s22 = sshll.u32 %s3247_s21, 4  ;;  %s3411_s22 = int_to_ptr.vmem [resolvable:$true] %s490_s22 }
  0x25   : > { %s4139_s20 = scalar_select %p3407_p3, 1, 0 }
  0x26   : > { %p2409_p4 = pneg %p3407_p3  ;;  %s3248_s23 = smov [#allocation10]  }
  0x27   : > { %4140 = sst [smem:[#allocation53_spill]] %s4139_s20  ;;  %s504_s24 = sshll.u32 %s3248_s23, 4  ;;  %s3422_s24 = int_to_ptr.vmem [resolvable:$true] %s504_s24 }
  0x28   : > { %p3418_p6 = pnand %p2409_p4, %p4112_p1  ;;  %s3249_s25 = smov [#allocation13]  }
  0x29   : > { %s3424_s26 = sshll.u32 %s3249_s25, 4  ;;  %s4142_s30 = sld [smem:[#allocation56_spill]]  ;;  %s529_s26 = int_to_ptr.vmem [resolvable:$true] %s3424_s26 }
  0x2a   : > { %p3434_p8 = pneg %p3418_p6 }
  0x2f   : > { %s4143_s17 = smov %s4142_s30  ;;  %s2615_s27 = scalar_lea.hbm %s4142_s30, 256 }
  0x30   : > { %p2616_p7 = scmp.ne.s32.totalorder %s4143_s17, %s2615_s27  ;;  %p2622_p11 = scmp.lt.u32.totalorder %s2615_s27, %s4143_s17 }
  0x32   : > { %p2618_p9 = pnand %p3434_p8, %p2616_p7 }
  0x34   : > { %p2619_p10 = pneg %p2618_p9 }
  0x36   : > { %p2624_p12 = pnand %p2622_p11, %p2619_p10 }
  0x38   : > { %2627 = shalt.err (!%p2624_p12)
}
  0x39   : > { %s2628_s18 = scalar_lea.vmem %s3411_s22, 256  ;;  %p2636_p4 = scmp.lt.s32.totalorder %s3411_s22, %s3411_s22 }
  0x3a   : > { %p2629_p13 = scmp.ne.s32.totalorder %s3411_s22, %s2628_s18  ;;  %p2637_p5 = scmp.lt.s32.totalorder %s2628_s18, %s2628_s18 }
  0x3c   : > { %p2631_p0 = pnand %p2629_p13, %p3434_p8  ;;  %p2638_p7 = por %p2637_p5, %p2636_p4 }
  0x3e   : > { %p2632_p2 = pneg %p2631_p0 }
  0x40   : > { %p2639_p9 = pnand %p2638_p7, %p2632_p2 }
  0x42   : > { %2642 = shalt.err (!%p2639_p9)
}
  0x43   : > { %s4114_s28 = smov 64   ;;  %s3251_s27 = smov 4  }
  0x44   : > { %2412 = dma.hbm_to_vmem [thread:$0]  (!%p3418_p6), %s4143_s17, 256, %s3411_s22, [#allocation8], %s4114_s28, %s4114_s28, %s3251_s27  }
  0x45   : > { %s4145_s3 = sld [smem:[#allocation57_spill]] }
  0x4b   : > { %s2643_s25 = scalar_lea.hbm %s4145_s3, 16 }
  0x4c   : > { %p2644_p5 = scmp.ne.s32.totalorder %s4145_s3, %s2643_s25  ;;  %p2650_p12 = scmp.lt.u32.totalorder %s2643_s25, %s4145_s3 }
  0x4e   : > { %p2646_p10 = pnand %p2644_p5, %p3434_p8 }
  0x50   : > { %p2647_p11 = pneg %p2646_p10 }
  0x52   : > { %p2652_p13 = pnand %p2650_p12, %p2647_p11 }
  0x54   : > { %2655 = shalt.err (!%p2652_p13)
}
  0x55   : > { %s2656_s22 = scalar_lea.vmem %s3422_s24, 16  ;;  %s2663_s29 = scalar_lea.vmem %s3422_s24, 32 }
  0x56   : > { %p2657_p0 = scmp.ne.s32.totalorder %s3422_s24, %s2656_s22  ;;  %p2664_p7 = scmp.lt.s32.totalorder %s3422_s24, %s3422_s24 }
  0x57   : > { %p2665_p9 = scmp.lt.s32.totalorder %s2663_s29, %s2656_s22 }
  0x58   : > { %p2659_p2 = pnand %p2657_p0, %p3434_p8 }
  0x59   : > { %p2666_p5 = por %p2665_p9, %p2664_p7 }
  0x5a   : > { %p2660_p4 = pneg %p2659_p2 }
  0x5c   : > { %p2667_p10 = pnand %p2666_p5, %p2660_p4 }
  0x5e   : > { %2670 = shalt.err (!%p2667_p10)
}
  0x5f   : > { %2415 = dma.hbm_to_vmem [thread:$0]  (!%p3418_p6), %s4145_s3, 16, %s3422_s24, [#allocation11]  }
  0x60   : > { %s4146_s5 = sld [smem:[#allocation59_spill]] }
  0x66   : > { %s2671_s21 = scalar_lea.hbm %s4146_s5, 16 }
  0x67   : > { %p2672_p11 = scmp.ne.s32.totalorder %s4146_s5, %s2671_s21  ;;  %p2678_p0 = scmp.lt.u32.totalorder %s2671_s21, %s4146_s5 }
  0x69   : > { %p2674_p12 = pnand %p2672_p11, %p3434_p8 }
  0x6b   : > { %p2675_p13 = pneg %p2674_p12 }
  0x6d   : > { %p2680_p2 = pnand %p2678_p0, %p2675_p13 }
  0x6f   : > { %2683 = shalt.err (!%p2680_p2)
}
  0x70   : > { %s2684_s29 = scalar_lea.vmem %s529_s26, 16  ;;  %s2691_s24 = scalar_lea.vmem %s529_s26, 32 }
  0x71   : > { %p2685_p4 = scmp.ne.s32.totalorder %s529_s26, %s2684_s29  ;;  %p2692_p5 = scmp.lt.s32.totalorder %s529_s26, %s529_s26 }
  0x72   : > { %p2693_p10 = scmp.lt.s32.totalorder %s2691_s24, %s2684_s29 }
  0x73   : > { %p2687_p7 = pnand %p2685_p4, %p3434_p8 }
  0x74   : > { %p2694_p1 = por %p2693_p10, %p2692_p5 }
  0x75   : > { %p2688_p9 = pneg %p2687_p7 }
  0x77   : > { %p2695_p3 = pnand %p2694_p1, %p2688_p9 }
  0x79   : > { %2698 = shalt.err (!%p2695_p3)
}
  0x7a   : > { %2421 = dma.hbm_to_vmem [thread:$0]  (!%p3418_p6), %s4146_s5, 16, %s529_s26, [#allocation14]  }
  0x7b   : > { %s3252_s30 = smov [#allocation16]   ;;  %s3253_s21 = smov [#allocation19]  }
  0x7c   : > { %s552_s20 = sshll.u32 %s3252_s30, 4  ;;  %s576_s23 = sshll.u32 %s3253_s21, 4  ;;  %s553_s20 = int_to_ptr.vmem [resolvable:$true] %s552_s20  ;;  %s577_s23 = int_to_ptr.vmem [resolvable:$true] %s576_s23 }
  0x7d   : > { %s4147_s7 = sld [smem:[#allocation61_spill]] }
  0x83   : > { %s2699_s22 = scalar_lea.hbm %s4147_s7, 16 }
  0x84   : > { %p2700_p1 = scmp.ne.s32.totalorder %s4147_s7, %s2699_s22  ;;  %p2706_p12 = scmp.lt.u32.totalorder %s2699_s22, %s4147_s7 }
  0x86   : > { %p2702_p3 = pnand %p2700_p1, %p3434_p8 }
  0x88   : > { %p2703_p11 = pneg %p2702_p3 }
  0x8a   : > { %p2708_p13 = pnand %p2706_p12, %p2703_p11 }
  0x8c   : > { %2711 = shalt.err (!%p2708_p13)
}
  0x8d   : > { %s2712_s26 = scalar_lea.vmem %s553_s20, 16  ;;  %s2719_s19 = scalar_lea.vmem %s553_s20, 32 }
  0x8e   : > { %p2713_p0 = scmp.ne.s32.totalorder %s553_s20, %s2712_s26  ;;  %p2720_p7 = scmp.lt.s32.totalorder %s553_s20, %s553_s20 }
  0x8f   : > { %p2721_p9 = scmp.lt.s32.totalorder %s2719_s19, %s2712_s26 }
  0x90   : > { %p2715_p2 = pnand %p2713_p0, %p3434_p8 }
  0x91   : > { %p2722_p5 = por %p2721_p9, %p2720_p7 }
  0x92   : > { %p2716_p4 = pneg %p2715_p2 }
  0x94   : > { %p2723_p10 = pnand %p2722_p5, %p2716_p4 }
  0x96   : > { %2726 = shalt.err (!%p2723_p10)
}
  0x97   : > { %2427 = dma.hbm_to_vmem [thread:$0]  (!%p3418_p6), %s4147_s7, 16, %s553_s20, [#allocation17]  }
  0x98   : > { %s4148_s9 = sld [smem:[#allocation63_spill]] }
  0x9e   : > { %s2727_s18 = scalar_lea.hbm %s4148_s9, 16 }
  0x9f   : > { %p2728_p1 = scmp.ne.s32.totalorder %s4148_s9, %s2727_s18  ;;  %p2734_p12 = scmp.lt.u32.totalorder %s2727_s18, %s4148_s9 }
  0xa1   : > { %p2730_p3 = pnand %p2728_p1, %p3434_p8 }
  0xa3   : > { %p2731_p11 = pneg %p2730_p3 }
  0xa5   : > { %p2736_p13 = pnand %p2734_p12, %p2731_p11 }
  0xa7   : > { %2739 = shalt.err (!%p2736_p13)
}
  0xa8   : > { %s2740_s26 = scalar_lea.vmem %s577_s23, 16  ;;  %s2747_s20 = scalar_lea.vmem %s577_s23, 32 }
  0xa9   : > { %p2741_p0 = scmp.ne.s32.totalorder %s577_s23, %s2740_s26  ;;  %p2748_p7 = scmp.lt.s32.totalorder %s577_s23, %s577_s23 }
  0xaa   : > { %p2749_p9 = scmp.lt.s32.totalorder %s2747_s20, %s2740_s26 }
  0xab   : > { %p2743_p2 = pnand %p2741_p0, %p3434_p8 }
  0xac   : > { %p2750_p5 = por %p2749_p9, %p2748_p7 }
  0xad   : > { %p2744_p4 = pneg %p2743_p2 }
  0xaf   : > { %p2751_p10 = pnand %p2750_p5, %p2744_p4 }
  0xb1   : > { %2754 = shalt.err (!%p2751_p10)
}
  0xb2   : > { %2433 = dma.hbm_to_vmem [thread:$0]  (!%p3418_p6), %s4148_s9, 16, %s577_s23, [#allocation20]  }
  0xb3   : > { %s3254_s21 = smov [#allocation22]   ;;  %s3255_s25 = smov [#allocation25]  }
  0xb4   : > { %s598_s28 = sshll.u32 %s3254_s21, 4  ;;  %s622_s18 = sshll.u32 %s3255_s25, 4  ;;  %s599_s28 = int_to_ptr.vmem [resolvable:$true] %s598_s28  ;;  %s623_s18 = int_to_ptr.vmem [resolvable:$true] %s622_s18 }
  0xb5   : > { %s2755_s24 = scalar_lea.hbm %s4089_s11, 16 }
  0xb6   : > { %p2756_p1 = scmp.ne.s32.totalorder %s4089_s11, %s2755_s24  ;;  %p2762_p12 = scmp.lt.u32.totalorder %s2755_s24, %s4089_s11 }
  0xb8   : > { %p2758_p3 = pnand %p2756_p1, %p3434_p8 }
  0xba   : > { %p2759_p11 = pneg %p2758_p3 }
  0xbc   : > { %p2764_p13 = pnand %p2762_p12, %p2759_p11 }
  0xbe   : > { %2767 = shalt.err (!%p2764_p13)
}
  0xbf   : > { %s2768_s23 = scalar_lea.vmem %s599_s28, 16  ;;  %s2775_s30 = scalar_lea.vmem %s599_s28, 32 }
  0xc0   : > { %p2769_p0 = scmp.ne.s32.totalorder %s599_s28, %s2768_s23  ;;  %p2776_p7 = scmp.lt.s32.totalorder %s599_s28, %s599_s28 }
  0xc1   : > { %p2777_p9 = scmp.lt.s32.totalorder %s2775_s30, %s2768_s23 }
  0xc2   : > { %p2771_p2 = pnand %p2769_p0, %p3434_p8 }
  0xc3   : > { %p2778_p5 = por %p2777_p9, %p2776_p7 }
  0xc4   : > { %p2772_p4 = pneg %p2771_p2 }
  0xc6   : > { %p2779_p10 = pnand %p2778_p5, %p2772_p4 }
  0xc8   : > { %2782 = shalt.err (!%p2779_p10)
}
  0xc9   : > { %2439 = dma.hbm_to_vmem [thread:$0]  (!%p3418_p6), %s4089_s11, 16, %s599_s28, [#allocation23]  }
  0xca   : > { %s2783_s24 = scalar_lea.hbm %s4091_s13, 16 }
  0xcb   : > { %p2784_p1 = scmp.ne.s32.totalorder %s4091_s13, %s2783_s24  ;;  %p2790_p12 = scmp.lt.u32.totalorder %s2783_s24, %s4091_s13 }
  0xcd   : > { %p2786_p3 = pnand %p2784_p1, %p3434_p8 }
  0xcf   : > { %p2787_p11 = pneg %p2786_p3 }
  0xd1   : > { %p2792_p13 = pnand %p2790_p12, %p2787_p11 }
  0xd3   : > { %2795 = shalt.err (!%p2792_p13)
}
  0xd4   : > { %s2796_s23 = scalar_lea.vmem %s623_s18, 16  ;;  %s2803_s28 = scalar_lea.vmem %s623_s18, 32 }
  0xd5   : > { %p2797_p0 = scmp.ne.s32.totalorder %s623_s18, %s2796_s23  ;;  %p2804_p7 = scmp.lt.s32.totalorder %s623_s18, %s623_s18 }
  0xd6   : > { %p2805_p9 = scmp.lt.s32.totalorder %s2803_s28, %s2796_s23 }
  0xd7   : > { %p2799_p2 = pnand %p2797_p0, %p3434_p8 }
  0xd8   : > { %p2806_p5 = por %p2805_p9, %p2804_p7 }
  0xd9   : > { %p2800_p4 = pneg %p2799_p2 }
  0xdb   : > { %p2807_p10 = pnand %p2806_p5, %p2800_p4 }
  0xdd   : > { %2810 = shalt.err (!%p2807_p10)
}
  0xde   : > { %2445 = dma.hbm_to_vmem [thread:$0]  (!%p3418_p6), %s4091_s13, 16, %s623_s18, [#allocation26]  }
  0xdf   : > { %s3256_s25 = smov [#allocation28]   ;;  %s3257_s29 = smov [#allocation12]  }
  0xe0   : > { %s646_s22 = sshll.u32 %s3256_s25, 4  ;;  %s514_s24 = sshll.u32 %s3257_s29, 4  ;;  %s647_s22 = int_to_ptr.vmem [resolvable:$true] %s646_s22  ;;  %s515_s24 = int_to_ptr.vmem [resolvable:$true] %s514_s24 }
  0xe1   : > { %s2811_s20 = scalar_lea.hbm %s4093_s15, 16 }
  0xe2   : > { %p2812_p1 = scmp.ne.s32.totalorder %s4093_s15, %s2811_s20  ;;  %p2818_p12 = scmp.lt.u32.totalorder %s2811_s20, %s4093_s15 }
  0xe4   : > { %p2814_p3 = pnand %p2812_p1, %p3434_p8 }
  0xe6   : > { %p2815_p11 = pneg %p2814_p3 }
  0xe8   : > { %p2820_p13 = pnand %p2818_p12, %p2815_p11 }
  0xea   : > { %2823 = shalt.err (!%p2820_p13)
}
  0xeb   : > { %s2824_s18 = scalar_lea.vmem %s647_s22, 16  ;;  %s2831_s21 = scalar_lea.vmem %s647_s22, 32 }
  0xec   : > { %p2825_p0 = scmp.ne.s32.totalorder %s647_s22, %s2824_s18  ;;  %p2832_p7 = scmp.lt.s32.totalorder %s647_s22, %s647_s22 }
  0xed   : > { %p2833_p9 = scmp.lt.s32.totalorder %s2831_s21, %s2824_s18 }
  0xee   : > { %p2827_p2 = pnand %p2825_p0, %p3434_p8 }
  0xef   : > { %p2834_p5 = por %p2833_p9, %p2832_p7 }
  0xf0   : > { %p2828_p4 = pneg %p2827_p2 }
  0xf2   : > { %p2835_p10 = pnand %p2834_p5, %p2828_p4 }
  0xf4   : > { %2838 = shalt.err (!%p2835_p10)
}
  0xf5   : > { %2451 = dma.hbm_to_vmem [thread:$0]  (!%p3418_p6), %s4093_s15, 16, %s647_s22, [#allocation29]  }
  0xf6   : > { %s4149_s4 = sld [smem:[#allocation58_spill]] }
  0xfc   : > { %s2839_s20 = scalar_lea.hbm %s4149_s4, 256 }
  0xfd   : > { %p2840_p1 = scmp.ne.s32.totalorder %s4149_s4, %s2839_s20  ;;  %p2846_p12 = scmp.lt.u32.totalorder %s2839_s20, %s4149_s4 }
  0xff   : > { %p2842_p3 = pnand %p2840_p1, %p3434_p8 }
 0x101   : > { %p2843_p11 = pneg %p2842_p3 }
 0x103   : > { %p2848_p13 = pnand %p2846_p12, %p2843_p11 }
 0x105   : > { %2851 = shalt.err (!%p2848_p13)
}
 0x106   : > { %s2852_s18 = scalar_lea.vmem %s515_s24, 256  ;;  %p2860_p7 = scmp.lt.s32.totalorder %s515_s24, %s515_s24 }
 0x107   : > { %p2853_p0 = scmp.ne.s32.totalorder %s515_s24, %s2852_s18  ;;  %p2861_p9 = scmp.lt.s32.totalorder %s2852_s18, %s2852_s18 }
 0x109   : > { %p2855_p2 = pnand %p2853_p0, %p3434_p8  ;;  %p2862_p5 = por %p2861_p9, %p2860_p7 }
 0x10b   : > { %p2856_p4 = pneg %p2855_p2 }
 0x10d   : > { %p2863_p10 = pnand %p2862_p5, %p2856_p4 }
 0x10f   : > { %2866 = shalt.err (!%p2863_p10)
}
 0x110   : > { %s4150_s22 = smov 64   ;;  %s3258_s29 = smov [#allocation15]  }
 0x111   : > { %2418 = dma.hbm_to_vmem [thread:$0]  (!%p3418_p6), %s4149_s4, 256, %s515_s24, [#allocation11], %s4150_s22, %s4150_s22, %s3251_s27  }
 0x112   : > { %s538_s0 = sshll.u32 %s3258_s29, 4  ;;  %s3259_s26 = smov [#allocation18]   ;;  %s539_s0 = int_to_ptr.vmem [resolvable:$true] %s538_s0 }
 0x113   : > { %s562_s20 = sshll.u32 %s3259_s26, 4  ;;  %s4151_s6 = sld [smem:[#allocation60_spill]]  ;;  %s563_s20 = int_to_ptr.vmem [resolvable:$true] %s562_s20 }
 0x119   : > { %s2867_s28 = scalar_lea.hbm %s4151_s6, 256 }
 0x11a   : > { %p2868_p1 = scmp.ne.s32.totalorder %s4151_s6, %s2867_s28  ;;  %p2874_p12 = scmp.lt.u32.totalorder %s2867_s28, %s4151_s6 }
 0x11c   : > { %p2870_p3 = pnand %p2868_p1, %p3434_p8 }
 0x11e   : > { %p2871_p11 = pneg %p2870_p3 }
 0x120   : > { %p2876_p13 = pnand %p2874_p12, %p2871_p11 }
 0x122   : > { %2879 = shalt.err (!%p2876_p13)
}
 0x123   : > { %s2880_s24 = scalar_lea.vmem %s539_s0, 256  ;;  %p2888_p7 = scmp.lt.s32.totalorder %s539_s0, %s539_s0 }
 0x124   : > { %p2881_p0 = scmp.ne.s32.totalorder %s539_s0, %s2880_s24  ;;  %p2889_p9 = scmp.lt.s32.totalorder %s2880_s24, %s2880_s24 }
 0x126   : > { %p2883_p2 = pnand %p2881_p0, %p3434_p8  ;;  %p2890_p5 = por %p2889_p9, %p2888_p7 }
 0x128   : > { %p2884_p4 = pneg %p2883_p2 }
 0x12a   : > { %p2891_p10 = pnand %p2890_p5, %p2884_p4 }
 0x12c   : > { %2894 = shalt.err (!%p2891_p10)
}
 0x12d   : > { %2424 = dma.hbm_to_vmem [thread:$0]  (!%p3418_p6), %s4151_s6, 256, %s539_s0, [#allocation14], %s4150_s22, %s4150_s22, %s3251_s27  }
 0x12e   : > { %s4152_s8 = sld [smem:[#allocation62_spill]] }
 0x134   : > { %s2895_s19 = scalar_lea.hbm %s4152_s8, 256 }
 0x135   : > { %p2896_p1 = scmp.ne.s32.totalorder %s4152_s8, %s2895_s19  ;;  %p2902_p12 = scmp.lt.u32.totalorder %s2895_s19, %s4152_s8 }
 0x137   : > { %p2898_p3 = pnand %p2896_p1, %p3434_p8 }
 0x139   : > { %p2899_p11 = pneg %p2898_p3 }
 0x13b   : > { %p2904_p13 = pnand %p2902_p12, %p2899_p11 }
 0x13d   : > { %2907 = shalt.err (!%p2904_p13)
}
 0x13e   : > { %s2908_s21 = scalar_lea.vmem %s563_s20, 256  ;;  %p2916_p7 = scmp.lt.s32.totalorder %s563_s20, %s563_s20 }
 0x13f   : > { %p2909_p0 = scmp.ne.s32.totalorder %s563_s20, %s2908_s21  ;;  %p2917_p9 = scmp.lt.s32.totalorder %s2908_s21, %s2908_s21 }
 0x141   : > { %p2911_p2 = pnand %p2909_p0, %p3434_p8  ;;  %p2918_p5 = por %p2917_p9, %p2916_p7 }
 0x143   : > { %p2912_p4 = pneg %p2911_p2 }
 0x145   : > { %p2919_p10 = pnand %p2918_p5, %p2912_p4 }
 0x147   : > { %2922 = shalt.err (!%p2919_p10)
}
 0x148   : > { %2430 = dma.hbm_to_vmem [thread:$0]  (!%p3418_p6), %s4152_s8, 256, %s563_s20, [#allocation17], %s4150_s22, %s4150_s22, %s3251_s27  }
 0x149   : > { %s3260_s3 = smov [#allocation21]   ;;  %s3261_s29 = smov [#allocation24]  }
 0x14a   : > { %s587_s25 = sshll.u32 %s3260_s3, 4  ;;  %s608_s26 = sshll.u32 %s3261_s29, 4  ;;  %s588_s25 = int_to_ptr.vmem [resolvable:$true] %s587_s25  ;;  %s609_s26 = int_to_ptr.vmem [resolvable:$true] %s608_s26 }
 0x14b   : > { %s4153_s10 = sld [smem:[#allocation64_spill]] }
 0x151   : > { %s2923_s28 = scalar_lea.hbm %s4153_s10, 16 }
 0x152   : > { %p2924_p1 = scmp.ne.s32.totalorder %s4153_s10, %s2923_s28  ;;  %p2930_p12 = scmp.lt.u32.totalorder %s2923_s28, %s4153_s10 }
 0x154   : > { %p2926_p3 = pnand %p2924_p1, %p3434_p8 }
 0x156   : > { %p2927_p11 = pneg %p2926_p3 }
 0x158   : > { %p2932_p13 = pnand %p2930_p12, %p2927_p11 }
 0x15a   : > { %2935 = shalt.err (!%p2932_p13)
}
 0x15b   : > { %s2936_s20 = scalar_lea.vmem %s588_s25, 16  ;;  %s2943_s24 = scalar_lea.vmem %s588_s25, 32 }
 0x15c   : > { %p2937_p0 = scmp.ne.s32.totalorder %s588_s25, %s2936_s20  ;;  %p2944_p7 = scmp.lt.s32.totalorder %s588_s25, %s588_s25 }
 0x15d   : > { %p2945_p9 = scmp.lt.s32.totalorder %s2943_s24, %s2936_s20 }
 0x15e   : > { %p2939_p2 = pnand %p2937_p0, %p3434_p8 }
 0x15f   : > { %p2946_p5 = por %p2945_p9, %p2944_p7 }
 0x160   : > { %p2940_p4 = pneg %p2939_p2 }
 0x162   : > { %p2947_p10 = pnand %p2946_p5, %p2940_p4 }
 0x164   : > { %2950 = shalt.err (!%p2947_p10)
}
 0x165   : > { %2436 = dma.hbm_to_vmem [thread:$0]  (!%p3418_p6), %s4153_s10, 16, %s588_s25, [#allocation20]  }
 0x166   : > { %s2951_s28 = scalar_lea.hbm %s4090_s12, 256 }
 0x167   : > { %p2952_p1 = scmp.ne.s32.totalorder %s4090_s12, %s2951_s28  ;;  %p2958_p12 = scmp.lt.u32.totalorder %s2951_s28, %s4090_s12 }
 0x169   : > { %p2954_p3 = pnand %p2952_p1, %p3434_p8 }
 0x16b   : > { %p2955_p11 = pneg %p2954_p3 }
 0x16d   : > { %p2960_p13 = pnand %p2958_p12, %p2955_p11 }
 0x16f   : > { %2963 = shalt.err (!%p2960_p13)
}
 0x170   : > { %s2964_s20 = scalar_lea.vmem %s609_s26, 256  ;;  %p2972_p7 = scmp.lt.s32.totalorder %s609_s26, %s609_s26 }
 0x171   : > { %p2965_p0 = scmp.ne.s32.totalorder %s609_s26, %s2964_s20  ;;  %p2973_p9 = scmp.lt.s32.totalorder %s2964_s20, %s2964_s20 }
 0x173   : > { %p2967_p2 = pnand %p2965_p0, %p3434_p8  ;;  %p2974_p5 = por %p2973_p9, %p2972_p7 }
 0x175   : > { %p2968_p4 = pneg %p2967_p2 }
 0x177   : > { %p2975_p10 = pnand %p2974_p5, %p2968_p4 }
 0x179   : > { %2978 = shalt.err (!%p2975_p10)
}
 0x17a   : > { %2442 = dma.hbm_to_vmem [thread:$0]  (!%p3418_p6), %s4090_s12, 256, %s609_s26, [#allocation23], %s4150_s22, %s4150_s22, %s3251_s27  }
 0x17b   : > { %s3262_s3 = smov [#allocation27]   ;;  %s3263_s19 = smov [#allocation30]  }
 0x17c   : > { %s632_s29 = sshll.u32 %s3262_s3, 4  ;;  %s657_s23 = sshll.u32 %s3263_s19, 4  ;;  %s633_s29 = int_to_ptr.vmem [resolvable:$true] %s632_s29  ;;  %s658_s23 = int_to_ptr.vmem [resolvable:$true] %s657_s23 }
 0x17d   : > { %s2979_s18 = scalar_lea.hbm %s4092_s14, 512 }
 0x17e   : > { %p2980_p1 = scmp.ne.s32.totalorder %s4092_s14, %s2979_s18  ;;  %p2986_p12 = scmp.lt.u32.totalorder %s2979_s18, %s4092_s14 }
 0x180   : > { %p2982_p3 = pnand %p2980_p1, %p3434_p8 }
 0x182   : > { %p2983_p11 = pneg %p2982_p3 }
 0x184   : > { %p2988_p13 = pnand %p2986_p12, %p2983_p11 }
 0x186   : > { %2991 = shalt.err (!%p2988_p13)
}
 0x187   : > { %s2992_s26 = scalar_lea.vmem %s633_s29, 512  ;;  %p3000_p7 = scmp.lt.s32.totalorder %s633_s29, %s633_s29 }
 0x188   : > { %p2993_p0 = scmp.ne.s32.totalorder %s633_s29, %s2992_s26  ;;  %p3001_p9 = scmp.lt.s32.totalorder %s2992_s26, %s2992_s26 }
 0x18a   : > { %p2995_p2 = pnand %p2993_p0, %p3434_p8  ;;  %p3002_p5 = por %p3001_p9, %p3000_p7 }
 0x18c   : > { %p2996_p4 = pneg %p2995_p2 }
 0x18e   : > { %p3003_p10 = pnand %p3002_p5, %p2996_p4 }
 0x190   : > { %3006 = shalt.err (!%p3003_p10)
}
 0x191   : > { %2448 = dma.hbm_to_vmem [thread:$0]  (!%p3418_p6), %s4092_s14, 512, %s633_s29, [#allocation26], %s4150_s22, %s4150_s22, %s3251_s27  }
 0x192   : > { %s3007_s30 = scalar_lea.hbm %s4094_s16, 16 }
 0x193   : > { %p3008_p1 = scmp.ne.s32.totalorder %s4094_s16, %s3007_s30  ;;  %p3014_p12 = scmp.lt.u32.totalorder %s3007_s30, %s4094_s16 }
 0x195   : > { %p3010_p3 = pnand %p3008_p1, %p3434_p8 }
 0x197   : > { %p3011_p11 = pneg %p3010_p3 }
 0x199   : > { %p3016_p13 = pnand %p3014_p12, %p3011_p11 }
 0x19b   : > { %3019 = shalt.err (!%p3016_p13)
}
 0x19c   : > { %s3020_s25 = scalar_lea.vmem %s658_s23, 16  ;;  %s3027_s27 = scalar_lea.vmem %s658_s23, 32 }
 0x19d   : > { %p3021_p0 = scmp.ne.s32.totalorder %s658_s23, %s3020_s25  ;;  %p3028_p7 = scmp.lt.s32.totalorder %s658_s23, %s658_s23 }
 0x19e   : > { %p3029_p9 = scmp.lt.s32.totalorder %s3027_s27, %s3020_s25 }
 0x19f   : > { %p3023_p2 = pnand %p3021_p0, %p3434_p8 }
 0x1a0   : > { %p3030_p5 = por %p3029_p9, %p3028_p7 }
 0x1a1   : > { %p3024_p4 = pneg %p3023_p2 }
 0x1a3   : > { %p3031_p10 = pnand %p3030_p5, %p3024_p4 }
 0x1a5   : > { %3034 = shalt.err (!%p3031_p10)
}
 0x1a6   : > { %2454 = dma.hbm_to_vmem [thread:$0]  (!%p3418_p6), %s4094_s16, 16, %s658_s23, [#allocation29]  }
 0x1a7   : > { %s3264_s26 = smov [#allocation31]   ;;  %s4154_s28 = sld [smem:[#allocation65_spill]] }
 0x1a8   : > { %s668_s24 = sshll.u32 %s3264_s26, 4  ;;  %s669_s24 = int_to_ptr.vmem [resolvable:$true] %s668_s24 }
 0x1ad   : > { %s4155_s18 = smov %s4154_s28  ;;  %s3035_s30 = scalar_lea.hbm %s4154_s28, 16 }
 0x1ae   : > { %p3036_p1 = scmp.ne.s32.totalorder %s4155_s18, %s3035_s30  ;;  %p3042_p12 = scmp.lt.u32.totalorder %s3035_s30, %s4155_s18 }
 0x1b0   : > { %p3038_p3 = pnand %p3036_p1, %p3434_p8 }
 0x1b2   : > { %p3039_p11 = pneg %p3038_p3 }
 0x1b4   : > { %p3044_p13 = pnand %p3042_p12, %p3039_p11 }
 0x1b6   : > { %3047 = shalt.err (!%p3044_p13)
}
 0x1b7   : > { %s3048_s23 = scalar_lea.vmem %s669_s24, 16  ;;  %s3055_s27 = scalar_lea.vmem %s669_s24, 32 }
 0x1b8   : > { %p3049_p0 = scmp.ne.s32.totalorder %s669_s24, %s3048_s23  ;;  %p3056_p7 = scmp.lt.s32.totalorder %s669_s24, %s669_s24 }
 0x1b9   : > { %p3057_p9 = scmp.lt.s32.totalorder %s3055_s27, %s3048_s23 }
 0x1ba   : > { %p3051_p2 = pnand %p3049_p0, %p3434_p8 }
 0x1bb   : > { %p3058_p5 = por %p3057_p9, %p3056_p7 }
 0x1bc   : > { %p3052_p4 = pneg %p3051_p2 }
 0x1be   : > { %p3059_p10 = pnand %p3058_p5, %p3052_p4 }
 0x1c0   : > { %3062 = shalt.err (!%p3059_p10)
}
 0x1c1   : > { %s4156_s26 = sld [smem:[#allocation51_spill]]  ;;  %s4157_s3 = sld [smem:[#allocation50_spill]] }
 0x1c2   : > { %s4158_s19 = sld [smem:[#allocation48_spill]]  ;;  %s4159_s28 = sld [smem:[#allocation47_spill]] }
 0x1c3   : > { %s4160_s1 = sld [smem:[#allocation46_spill]]  ;;  %s4161_s30 = sld [smem:[#allocation52_spill]] }
 0x1c4   : > { %2457 = dma.hbm_to_vmem [thread:$0]  (!%p3418_p6), %s4155_s18, 16, %s669_s24, [#allocation32]  }
 0x1c5   : > { %s4167_s4 = sld [smem:[#allocation54_spill]] }
 0x1c7   : > { %s2111_s21 = sadd.s32 4294967294, %s4156_s26   ;;  %s57_s0 = sadd.s32 1, %s4157_s3 }
 0x1c8   : > { %p59_p8 = scmp.ge.s32.totalorder %s57_s0, 2  ;;  %s64_s2 = sadd.s32 1, %s4158_s19 }
 0x1c9   : > { %p71_p1 = scmp.ne.s32.totalorder %s4158_s19, %s4159_s28  ;;  %p72_p3 = scmp.eq.s32.totalorder %s4156_s26, 0 }
 0x1ca   : > { %s4209_s0 = smov (%p59_p8, %s57_s0), 0  ;;  %p77_p12 = scmp.ne.s32.totalorder %s4159_s28, %s4160_s1 }
 0x1cb   : > { %p3758_p11 = por %p72_p3, %p71_p1  ;;  %s61_s24 = ssub.s32 %s4157_s3, %s4209_s0 }
 0x1cc   : > { %p465_p6 = scmp.eq.s32.totalorder %s4161_s30, 1  ;;  %p62_p13 = scmp.eq.s32.totalorder %s61_s24, 0 }
 0x1cd   : > { %p4163_p0 = scmp.eq.s32.totalorder %s4161_s30, 0  ;;  %p471_p7 = scmp.eq.s32.totalorder %s2111_s21, 1 }
 0x1ce   : > { %p3773_p4 = por %p465_p6, %p71_p1  ;;  %p2485_p5 = scmp.lt.s32.totalorder %s4156_s26, 2 }
 0x1cf   : > { %p3769_p2 = por %p4163_p0, %p77_p12  ;;  %p3780_p9 = por %p471_p7, %p77_p12 }
 0x1d0   : > { %s4165_s23 = scalar_select %p3773_p4, 1, 0 }
 0x1d1   : > { %s4164_s25 = scalar_select %p3769_p2, 1, 0 }
 0x1d2   : > { %s3778_s27 = scalar_select %p62_p13, %s4158_s19, %s64_s2  }
 0x1d3   : > { %s4166_s22 = scalar_select %p3780_p9, 1, 0 }
 0x1d4   : > { %s3786_s29 = sand.u32 1, %s4158_s19   ;;  %s2131_s28 = sshll.u32 %s4157_s3, 7 }
 0x1d5   : > { %s2130_s1 = sshll.u32 %s3786_s29, 3  ;;  %s3793_s5 = scalar_lea.hbm %s4167_s4, %s2131_s28 }
 0x1d6   : > { %s683_s21 = scalar_lea.vmem [#allocation4], %s2130_s1  ;;  %p3797_p10 = pnand %p2485_p5, %p3758_p11 }
 0x1d7   : > { %s690_s2 = sshll.u32 %s683_s21, 4  ;;  %s680_s7 = scalar_lea.sflag [#allocation5], %s3786_s29  ;;  %s3801_s2 = int_to_ptr.vmem [resolvable:$true] %s690_s2 }
 0x1d8   : > { %s3063_s30 = scalar_lea.hbm %s3793_s5, 128  ;;  %p3065_p1 = pneg %p3797_p10 }
 0x1d9   : > { %p3064_p8 = scmp.ne.s32.totalorder %s3793_s5, %s3063_s30  ;;  %s3068_s1 = scalar_lea.hbm %s4167_s4, 256 }
 0x1da   : > { %p3069_p11 = scmp.lt.u32.totalorder %s3793_s5, %s4167_s4  ;;  %p3070_p6 = scmp.lt.u32.totalorder %s3068_s1, %s3063_s30 }
 0x1db   : > { %p3066_p3 = pnand %p3065_p1, %p3064_p8  ;;  %p3072_p0 = scmp.lt.u32.totalorder %s3063_s30, %s3793_s5 }
 0x1dc   : > { %p3071_p13 = por %p3070_p6, %p3069_p11 }
 0x1dd   : > { %p3067_p12 = pneg %p3066_p3 }
 0x1de   : > { %p3073_p7 = por %p3072_p0, %p3071_p13 }
 0x1e0   : > { %p3074_p5 = pnand %p3073_p7, %p3067_p12 }
 0x1e2   : > { %3077 = shalt.err (!%p3074_p5)
}
 0x1e3   : > { %s3078_s19 = scalar_lea.vmem %s3801_s2, 128  ;;  %s3265_s28 = smov [#allocation4]  }
 0x1e4   : > { %p3079_p8 = scmp.ne.s32.totalorder %s3801_s2, %s3078_s19  ;;  %s3083_s20 = sshll.u32 %s3265_s28, 4  ;;  %s3084_s20 = int_to_ptr.vmem [resolvable:$false] %s3083_s20 }
 0x1e5   : > { %s3085_s24 = scalar_lea.vmem %s3084_s20, 256  ;;  %p3086_p4 = scmp.lt.s32.totalorder %s3801_s2, %s3084_s20 }
 0x1e6   : > { %p3081_p3 = pnand %p3079_p8, %p3065_p1  ;;  %p3087_p11 = scmp.lt.s32.totalorder %s3085_s24, %s3078_s19 }
 0x1e8   : > { %p3082_p9 = pneg %p3081_p3  ;;  %p3088_p6 = por %p3087_p11, %p3086_p4 }
 0x1ea   : > { %p3089_p13 = pnand %p3088_p6, %p3082_p9 }
 0x1ec   : > { %3092 = shalt.err (!%p3089_p13)
}
 0x1ed   : > { %2461 = dma.hbm_to_vmem [thread:$0]  (!%p3797_p10), %s3793_s5, 128, %s3801_s2, %s680_s7  }
 0x1ee   : > { %s2132_s30 = sshll.u32 %s4157_s3, 4  ;;  %s4169_s28 = sld [smem:[#allocation55_spill]] }
 0x1ef   : > { %s700_s19 = scalar_lea.vmem [#allocation7], %s3786_s29  ;;  %s4171_s24 = sand.u32 1, %s4156_s26  }
 0x1f0   : > { %s707_s20 = sshll.u32 %s700_s19, 4  ;;  %s698_s9 = scalar_lea.sflag [#allocation8], %s4171_s24  ;;  %s708_s20 = int_to_ptr.vmem [resolvable:$true] %s707_s20 }
 0x1f4   : > { %s4170_s4 = smov %s4169_s28  ;;  %s3834_s8 = scalar_lea.hbm %s4169_s28, %s2132_s30 }
 0x1f5   : > { %s3093_s10 = scalar_lea.hbm %s3834_s8, 16  ;;  %s3098_s3 = scalar_lea.hbm %s4170_s4, 32 }
 0x1f6   : > { %p3094_p4 = scmp.ne.s32.totalorder %s3834_s8, %s3093_s10  ;;  %p3099_p0 = scmp.lt.u32.totalorder %s3834_s8, %s4170_s4 }
 0x1f7   : > { %p3100_p7 = scmp.lt.u32.totalorder %s3098_s3, %s3093_s10  ;;  %p3102_p8 = scmp.lt.u32.totalorder %s3093_s10, %s3834_s8 }
 0x1f8   : > { %p3096_p9 = pnand %p3094_p4, %p3065_p1 }
 0x1f9   : > { %p3101_p5 = por %p3100_p7, %p3099_p0 }
 0x1fa   : > { %p3097_p12 = pneg %p3096_p9 }
 0x1fb   : > { %p3103_p3 = por %p3102_p8, %p3101_p5 }
 0x1fd   : > { %p3104_p11 = pnand %p3103_p3, %p3097_p12 }
 0x1ff   : > { %3107 = shalt.err (!%p3104_p11)
}
 0x200   : > { %s3108_s26 = scalar_lea.vmem %s708_s20, 16  ;;  %s3266_s29 = smov [#allocation7]  }
 0x201   : > { %p3109_p6 = scmp.ne.s32.totalorder %s708_s20, %s3108_s26  ;;  %s3113_s1 = sshll.u32 %s3266_s29, 4  ;;  %s3114_s1 = int_to_ptr.vmem [resolvable:$false] %s3113_s1 }
 0x202   : > { %s3115_s21 = scalar_lea.vmem %s3114_s1, 32  ;;  %p3116_p9 = scmp.lt.s32.totalorder %s708_s20, %s3114_s1 }
 0x203   : > { %p3111_p13 = pnand %p3109_p6, %p3065_p1  ;;  %p3117_p2 = scmp.lt.s32.totalorder %s3115_s21, %s3108_s26 }
 0x205   : > { %p3112_p4 = pneg %p3111_p13  ;;  %p3118_p0 = por %p3117_p2, %p3116_p9 }
 0x207   : > { %p3119_p7 = pnand %p3118_p0, %p3112_p4 }
 0x209   : > { %3122 = shalt.err (!%p3119_p7)
}
 0x20a   : > { %2464 = dma.hbm_to_vmem [thread:$0]  (!%p3797_p10), %s3834_s8, 16, %s708_s20, %s698_s9  }
 0x20b   : > { %s4172_s10 = sld [smem:[#allocation53_spill]] }
 0x211   : > { %p4173_p12 = scmp.ne.s32.totalorder %s4172_s10, 0 }
 0x212   : > { %s4174_s28 = sld [smem:[#allocation47_spill]] (!%p4173_p12)  ;;  %p4175_p2 = scmp.ne.s32.totalorder (!%p4173_p12), %s4164_s25, 0 }
 0x213   : > { %716 = sbr.rel (%p4173_p12) target bundleno = 3129 (0xc39), region = 92 }
 0x218   : > { %s3861_s19 = sand.u32 (!%p4173_p12), 1, %s4174_s28  }
 0x219   : > { %s2134_s24 = sshll.u32 (!%p4173_p12), %s3861_s19, 3  ;;  %s719_s5 = scalar_lea.sflag (!%p4173_p12), [#allocation5], %s3861_s19 }
 0x21a   : > { %s3867_s7 = scalar_lea.vmem [#allocation4], %s2134_s24 }
 0x21b   : > { %3176 = dma.done.wait (%p4175_p2), %s719_s5, 128  }
 0x21c   : > { %3178 = vsyncadd (%p4175_p2), %s719_s5, 4294967168  ;;  %s4176_s6 = sld [smem:[#allocation52_spill]]  ;;  %s730_s20 = scalar_lea.vmem [#allocation7], %s3861_s19 }
 0x222   : > { %s727_s8 = sand.u32 1, %s4176_s6  }
 0x223   : > { %s728_s9 = scalar_lea.sflag [#allocation8], %s727_s8 }
 0x224   : > { %3180 = dma.done.wait (%p4175_p2), %s728_s9, 16  }
 0x225   : > { %3182 = vsyncadd (%p4175_p2), %s728_s9, 4294967280  ;;  %p4177_p10 = scmp.eq.s32.totalorder %s4176_s6, 0 }
 0x227   : > { %3184 = dma.done.wait (%p4177_p10), [#allocation8], 256   ;;  %p4178_p1 = pmov %p4177_p10 }
 0x229   : > { %3186 = vsyncadd (%p4178_p1), [#allocation8], 4294967040  ;;  %p4179_p5 = pmov %p4178_p1 }
 0x22a   : > { %p4180_p8 = pmov %p4178_p1 }
 0x22b   : > { %3188 = dma.done.wait (%p4179_p5), [#allocation11], 272  }
 0x22c   : > { %3190 = vsyncadd (%p4180_p8), [#allocation11], 4294967024  ;;  %p4181_p3 = pmov %p4178_p1 }
 0x22d   : > { %p4182_p11 = pmov %p4178_p1 }
 0x22e   : > { %3192 = dma.done.wait (%p4181_p3), [#allocation14], 272  }
 0x22f   : > { %3194 = vsyncadd (%p4182_p11), [#allocation14], 4294967024  ;;  %p4183_p6 = pmov %p4178_p1 }
 0x230   : > { %p4184_p13 = pmov %p4178_p1 }
 0x231   : > { %3196 = dma.done.wait (%p4183_p6), [#allocation17], 272  }
 0x232   : > { %3198 = vsyncadd (%p4184_p13), [#allocation17], 4294967024  ;;  %p4185_p4 = pmov %p4178_p1 }
 0x233   : > { %p4186_p9 = pmov %p4178_p1 }
 0x234   : > { %3200 = dma.done.wait (%p4185_p4), [#allocation20], 32  }
 0x235   : > { %3202 = vsyncadd (%p4186_p9), [#allocation20], 4294967264  ;;  %p4187_p0 = pmov %p4178_p1 }
 0x237   : > { %3204 = dma.done.wait (%p4187_p0), [#allocation23], 272   ;;  %p4188_p7 = pmov %p4187_p0 }
 0x238   : > { %p4189_p12 = pmov %p4187_p0 }
 0x239   : > { %3206 = vsyncadd (%p4188_p7), [#allocation23], 4294967024 }
 0x23a   : > { %3208 = dma.done.wait (%p4189_p12), [#allocation26], 528   ;;  %p4190_p2 = pmov %p4187_p0 }
 0x23b   : > { %p4191_p10 = pmov %p4187_p0 }
 0x23c   : > { %3210 = vsyncadd (%p4190_p2), [#allocation26], 4294966768 }
 0x23d   : > { %3212 = dma.done.wait (%p4191_p10), [#allocation29], 32   ;;  %p4192_p1 = pmov %p4187_p0 }
 0x23e   : > { %p4193_p5 = pmov %p4187_p0 }
 0x23f   : > { %3214 = vsyncadd (%p4192_p1), [#allocation29], 4294967264 }
 0x240   : > { %3216 = dma.done.wait (%p4193_p5), [#allocation32], 16   ;;  %p4194_p8 = pmov %p4187_p0 }
 0x241   : > { %v3267_v0 = vmov 0.0   ;;  %vm3268_vm0 = vmmov 0   ;;  %v2577_v1 = vld [vmem:[#allocation12] sm:$0xff]   ;;  %v2578_v2 = vld [vmem:[#allocation12 + $0x8] sm:$0xff]   ;;  %vm882_vm1 = vcmask 261120   ;;  %v2580_v6 = vld [vmem:[#allocation9 + $0x8] sm:$0xff]  }
 0x242   : > { %3218 = vsyncadd (%p4194_p8), [#allocation32], 4294967280  ;;  %2239 = vmatprep.subr.bf16.mxu0 %v3267_v0  ;;  %2243 = vmatprep.mubr.msk.bf16.mxu0 %vm3268_vm0, %v3267_v0  ;;  %v3922_v3 = vld [vmem:[%s3867_s7] sm:$0xff]  ;;  %v2579_v4 = vld [vmem:[#allocation9] sm:$0xff]   ;;  %vm990_vm2 = vcmask 257024   ;;  %vm1070_vm3 = vcmask 64512  }
 0x243   : > { %2247 = vmatprep.subr.bf16.mxu1 %v3267_v0  ;;  %2251 = vmatprep.mubr.msk.bf16.mxu1 %vm3268_vm0, %v3267_v0  ;;  %v858_v5 = vpack.c.bf16 %v3922_v3, %v3922_v3  ;;  %v2581_v7 = vld [vmem:[#allocation15] sm:$0xff]   ;;  %v2582_v8 = vld [vmem:[#allocation15 + $0x8] sm:$0xff]   ;;  %v2152_v9 = vld [vmem:[#allocation13] ss:$0 sm:$0xff]  ;;  %s3269_s25 = smov 112   ;;  %s3270_s3 = smov 120  }
 0x244   : > { %2240 = vmatpush3.bf16.msra.mxu0 %v2577_v1  ;;  %2248 = vmatpush3.bf16.msra.mxu1 %v2581_v7  ;;  %v2160_v16 = vld [vmem:[#allocation10] ss:$0 sm:$0xff]  ;;  %s3271_s2 = smov 104   ;;  %v2156_v26 = vld [vmem:[#allocation16] ss:$0 sm:$0xff]  ;;  %vm1140_vm4 = vcmask 1043456  }
 0x245   : > { %2241 = vmatprep.subr.bf16.mxu0 %v3267_v0  ;;  %2249 = vmatprep.subr.bf16.mxu1 %v3267_v0  ;;  %v2165_v45 = vld [vmem:[%s730_s20] ss:$0 sm:$0xff]  ;;  %vm1185_vm5 = vcmask 60416   ;;  %s3272_s30 = smov 8   ;;  %s3273_s26 = smov 16   ;;  %vm1313_vm6 = vcmask 126016  }
 0x246   : > { %s3274_s29 = smov 24   ;;  %vm1434_vm7 = vcmask 191616   ;;  %vm1555_vm8 = vcmask 257216   ;;  %vm1767_vm9 = vcmask 523264   ;;  %s4195_s1 = sld [smem:[#allocation49_spill]] }
 0x247   : > { %s850_s10 = scalar_lea.vmem [#allocation33], %s2134_s24  ;;  %s4196_s6 = sld [smem:[#allocation66_spill]] }
 0x248   : > { %2242 = vmatpush3.bf16.msra.mxu0 %v2578_v2  ;;  %2250 = vmatpush3.bf16.msra.mxu1 %v2582_v8  ;;  %s1857_s28 = sshll.u32 %s850_s10, 4  ;;  %s1843_s9 = scalar_lea.sflag [#allocation6], %s3861_s19  ;;  %s4030_s28 = int_to_ptr.vmem [resolvable:$true] %s1857_s28 }
 0x249   : > { %2255 = vmatprep.subr.bf16.mxu0 %v3267_v0  ;;  %2263 = vmatprep.subr.bf16.mxu1 %v3267_v0  ;;  %s3123_s20 = scalar_lea.vmem %s4030_s28, 128  ;;  %p4197_p11 = scmp.ne.s32.totalorder %s4165_s23, 0 }
 0x24a   : > { %p3124_p3 = scmp.ne.s32.totalorder %s4030_s28, %s3123_s20  ;;  %s3275_s24 = smov [#allocation33]  }
 0x24b   : > { %2244 = vmatmul.mubr.msk.bf16.vlgmr.msra.gmra.mrb[0].mxu0 %vm882_vm1, %v858_v5  ;;  %2252 = vmatmul.mubr.msk.bf16.vlgmr.msra.gmra.mrb[0].mxu1 %vm882_vm1, %v858_v5 }
 0x24c   : > { %2256 = vmatpush3.bf16.msra.mxu0 %v2579_v4  ;;  %2259 = vmatprep.mubr.msk.bf16.mxu0 %vm3268_vm0, %v3267_v0  ;;  %s2197_s21 = sshll.u32 %s4195_s1, 7  ;;  %p3125_p6 = pnand %p3124_p3, %p4197_p11 }
 0x24d   : > { %2257 = vmatprep.subr.bf16.mxu0 %v3267_v0  ;;  %2265 = vmatprep.mubr.msk.bf16.mxu1 %vm3268_vm0, %v3267_v0  ;;  %s4028_s8 = scalar_lea.hbm %s4196_s6, %s2197_s21 }
 0x24e   : > { %p3126_p13 = pneg %p3125_p6 }
 0x250   : > { %2258 = vmatpush3.bf16.msra.mxu0 %v2580_v6 }
 0x251   : > { %2269 = vmatprep.subr.bf16.mxu0 %v3267_v0 }
 0x253   : > { %2260 = vmatmul.mubr.msk.bf16.vlgmr.msra.gmra.mrb[4].mxu0 %vm882_vm1, %v858_v5 }
 0x254   : > { %2271 = vmatprep.mubr.msk.bf16.mxu0 %vm3268_vm0, %v3267_v0 }
 0x31e   : > { %v920_v10 = vpop.f32.mrb[0].mxu0  ;;  %v983_v27 = vpop.f32.mrb[0].mxu1 }
 0x31f   : > { %v921_v11 = vadd.f32 %v2152_v9, %v920_v10  ;;  %v2245_v12 = vpop.f32.mrb[1].mxu0  ;;  %v984_v28 = vadd.f32 %v2156_v26, %v983_v27  ;;  %v2253_v29 = vpop.f32.mrb[1].mxu1 }
 0x320   : > { %v923_v13 = vpop.f32.mrb[2].mxu0  ;;  %v986_v30 = vpop.f32.mrb[2].mxu1 }
 0x321   : > { %v989_v14 = vpack.c.bf16 %v921_v11, %v921_v11  ;;  %v2246_v15 = vpop.f32.mrb[3].mxu0  ;;  %v992_v31 = vpack.c.bf16 %v984_v28, %v984_v28  ;;  %v2254_v32 = vpop.f32.mrb[3].mxu1 }
 0x323   : > { %991 = vst.msk [vmem:[#allocation2] sm:$0xf] %vm990_vm2, %v989_v14  ;;  %994 = vst.msk [vmem:[#allocation2 + $0x4] sm:$0xf] %vm990_vm2, %v992_v31 }
 0x326   : > { %v1060_v17 = vpop.f32.mrb[4].mxu0 }
 0x327   : > { %v2261_v18 = vpop.f32.mrb[5].mxu0  ;;  %v1061_v20 = vadd.f32 %v2160_v16, %v1060_v17 }
 0x328   : > { %v1063_v19 = vpop.f32.mrb[6].mxu0 }
 0x329   : > { %v2262_v21 = vpop.f32.mrb[7].mxu0  ;;  %v1066_v25 = vpack.c.bf16 %v1061_v20, %v1061_v20 }
 0x32a   : > { %v1067_v22 = vld [vmem:[#allocation2] sm:$0xf]  ;;  %v3954_v33 = vld [vmem:[#allocation2 + $0x4] sm:$0xf] }
 0x32b   : > { %v1075_v23 = vsel %vm1070_vm3, %v1067_v22, 0  ;;  %v2167_v24 = vcombine.low %v1067_v22, %v1067_v22  ;;  %v1142_v34 = vsel %vm1140_vm4, %v3954_v33, 0  ;;  %v2169_v16 = vcombine.low %v3954_v33, %v3954_v33 }
 0x32c   : > { %2264 = vmatpush3.bf16.xpose.msra.mxu1 %v1075_v23  ;;  %2270 = vmatpush3.bf16.msra.mxu0 %v1142_v34 }
 0x32d   : > { %1317 = vrot.lane.b32.xlu1 %v2167_v24, %s3269_s25  ;;  %1193 = vrot.lane.b32.xlu0 %v2167_v24, %s3270_s3 }
 0x32e   : > { %2275 = vmatprep.subr.bf16.mxu1 %v3267_v0  ;;  %2281 = vmatprep.subr.bf16.mxu0 %v3267_v0 }
 0x331   : > { %1315 = vrot.lane.b32.xlu1 %v1066_v25, %s3269_s25  ;;  %1188 = vrot.lane.b32.xlu0 %v1066_v25, %s3270_s3 }
 0x333   : > { %2266 = vmatmul.mubr.msk.bf16.vlgmr.msra.gmra.mrb[4].mxu1 %vm1070_vm3, %v1066_v25 }
 0x334   : > { %2277 = vmatprep.mubr.msk.bf16.mxu1 %vm3268_vm0, %v3267_v0 }
 0x335   : > { %1436 = vrot.lane.b32.xlu1 %v1066_v25, %s3271_s2  ;;  %1438 = vrot.lane.b32.xlu0 %v2167_v24, %s3271_s2 }
 0x39f   : > { %v1194_v35 = vpop.permute.xlu0 %1193  ;;  %v1318_v37 = vpop.permute.xlu1 %1317 }
 0x3a0   : > { %v1199_v36 = vsel %vm1070_vm3, %v1194_v35, 0  ;;  %v1323_v39 = vsel %vm1070_vm3, %v1318_v37, 0 }
 0x3a1   : > { %2276 = vmatpush3.bf16.xpose.msra.mxu1 %v1199_v36 }
 0x3a2   : > { %2287 = vmatprep.subr.bf16.mxu1 %v3267_v0 }
 0x3a3   : > { %v1189_v38 = vpop.permute.xlu0 %1188  ;;  %v1316_v41 = vpop.permute.xlu1 %1315 }
 0x3a7   : > { %v1439_v40 = vpop.permute.xlu0 %1438  ;;  %v1437_v43 = vpop.permute.xlu1 %1436 }
 0x3a8   : > { %2278 = vmatmul.mubr.msk.bf16.vlgmr.msra.gmra.mrb[8].mxu1 %vm1070_vm3, %v1189_v38  ;;  %v1444_v42 = vsel %vm1070_vm3, %v1439_v40, 0 }
 0x3a9   : > { %2288 = vmatpush3.bf16.xpose.msra.mxu1 %v1323_v39  ;;  %2289 = vmatprep.mubr.msk.bf16.mxu1 %vm3268_vm0, %v3267_v0 }
 0x3aa   : > { %2299 = vmatprep.subr.bf16.mxu1 %v3267_v0 }
 0x3b0   : > { %2290 = vmatmul.mubr.msk.bf16.vlgmr.msra.gmra.mrb[12].mxu1 %vm1070_vm3, %v1316_v41 }
 0x3b1   : > { %2300 = vmatpush3.bf16.xpose.msra.mxu1 %v1444_v42  ;;  %2301 = vmatprep.mubr.msk.bf16.mxu1 %vm3268_vm0, %v3267_v0 }
 0x3b2   : > { %2311 = vmatprep.subr.bf16.mxu1 %v3267_v0 }
 0x3b8   : > { %2302 = vmatmul.mubr.msk.bf16.vlgmr.msra.gmra.mrb[16].mxu1 %vm1070_vm3, %v1437_v43 }
 0x3b9   : > { %2315 = vmatprep.mubr.msk.bf16.mxu1 %vm3268_vm0, %v3267_v0 }
 0x406   : > { %v1111_v44 = vpop.f32.mrb[4].mxu1 }
 0x407   : > { %v1117_v46 = vmul.f32 0.35355338, %v1111_v44  ;;  %v2267_v47 = vpop.f32.mrb[5].mxu1 }
 0x408   : > { %v1114_v48 = vpop.f32.mrb[6].mxu1 }
 0x409   : > { %v2268_v49 = vpop.f32.mrb[7].mxu1  ;;  %v1124_v50 = vadd.f32 %v2165_v45, %v1117_v46 }
 0x40b   : > { %v1125_v51 = vsel %vm1070_vm3, %v1124_v50, -inf }
 0x40c   : > { %1126 = vmax.xlane.f32.xlu0 %v1125_v51 }
 0x47b   : > { %v1235_v52 = vpop.f32.mrb[8].mxu1 }
 0x47c   : > { %v1241_v53 = vmul.f32 0.35355338, %v1235_v52  ;;  %v2279_v54 = vpop.f32.mrb[9].mxu1 }
 0x47d   : > { %v1238_v55 = vpop.f32.mrb[10].mxu1 }
 0x47e   : > { %v2280_v56 = vpop.f32.mrb[11].mxu1  ;;  %v1242_v57 = vadd.f32 %v2165_v45, %v1241_v53 }
 0x480   : > { %v1243_v58 = vsel %vm1070_vm3, %v1242_v57, -inf }
 0x481   : > { %1244 = vmax.xlane.f32.xlu1 %v1243_v58 }
 0x483   : > { %v1359_v59 = vpop.f32.mrb[12].mxu1 }
 0x484   : > { %v1365_v60 = vmul.f32 0.35355338, %v1359_v59  ;;  %v2291_v61 = vpop.f32.mrb[13].mxu1 }
 0x485   : > { %v1362_v62 = vpop.f32.mrb[14].mxu1 }
 0x486   : > { %v2292_v63 = vpop.f32.mrb[15].mxu1  ;;  %v1366_v1 = vadd.f32 %v2165_v45, %v1365_v60 }
 0x488   : > { %v1367_v2 = vsel %vm1070_vm3, %v1366_v1, -inf }
 0x489   : > { %1368 = vmax.xlane.f32.xlu0 %v1367_v2 }
 0x48b   : > { %v1480_v4 = vpop.f32.mrb[16].mxu1 }
 0x48c   : > { %v1486_v5 = vmul.f32 0.35355338, %v1480_v4  ;;  %v2303_v6 = vpop.f32.mrb[17].mxu1  ;;  %v2586_v4 = vld [vmem:[#allocation18 + $0x8] sm:$0xff]  }
 0x48d   : > { %v1483_v7 = vpop.f32.mrb[18].mxu1 }
 0x48e   : > { %v2304_v8 = vpop.f32.mrb[19].mxu1  ;;  %v1487_v9 = vadd.f32 %v2165_v45, %v1486_v5 }
 0x490   : > { %v1488_v10 = vsel %vm1070_vm3, %v1487_v9, -inf }
 0x491   : > { %1489 = vmax.xlane.f32.xlu0 %v1488_v10 }
 0x499   : > { %v1127_v11 = vpop.xlane.xlu0 %1126 }
 0x49a   : > { %v1128_v12 = vsub.f32 %v1124_v50, %v1127_v11 }
 0x49c   : > { %v1129_v13 = vmul.f32 1.442695, %v1128_v12 }
 0x49e   : > { %2593 = vpow2.f32 %v1129_v13 }
 0x4a8   : > { %v2594_v14 = vpop.eup %2593 }
 0x4a9   : > { %v1131_v15 = vsel %vm1070_vm3, %v2594_v14, 0.0 }
 0x4aa   : > { %1132 = vadd.xlane.f32.xlu1 %v1131_v15 }
 0x4bb   : > { %1258 = vrot.lane.b32.xlu1 %v2169_v16, %s3270_s3 }
 0x50e   : > { %v1245_v17 = vpop.xlane.xlu1 %1244 }
 0x50f   : > { %v1246_v18 = vsub.f32 %v1242_v57, %v1245_v17 }
 0x511   : > { %v1247_v19 = vmul.f32 1.442695, %v1246_v18  ;;  %v2178_v18 = vld [vmem:[#allocation19] ss:$0 sm:$0xff] }
 0x513   : > { %2595 = vpow2.f32 %v1247_v19 }
 0x516   : > { %v1369_v20 = vpop.xlane.xlu0 %1368 }
 0x517   : > { %v1370_v21 = vsub.f32 %v1366_v1, %v1369_v20  ;;  %v2585_v1 = vld [vmem:[#allocation18] sm:$0xff]  }
 0x518   : > { %2312 = vmatpush3.bf16.msra.mxu1 %v2585_v1 }
 0x519   : > { %v1371_v22 = vmul.f32 1.442695, %v1370_v21  ;;  %2313 = vmatprep.subr.bf16.mxu1 %v3267_v0 }
 0x51b   : > { %2597 = vpow2.f32 %v1371_v22 }
 0x51c   : > { %2314 = vmatpush3.bf16.msra.mxu1 %v2586_v4 }
 0x51d   : > { %v2596_v23 = vpop.eup %2595  ;;  %2327 = vmatprep.subr.bf16.mxu1 %v3267_v0 }
 0x51e   : > { %v1490_v24 = vpop.xlane.xlu0 %1489  ;;  %v1249_v25 = vsel %vm1070_vm3, %v2596_v23, 0.0 }
 0x51f   : > { %v1491_v26 = vsub.f32 %v1487_v9, %v1490_v24  ;;  %1250 = vadd.xlane.f32.xlu0 %v1249_v25 }
 0x521   : > { %v1492_v27 = vmul.f32 1.442695, %v1491_v26 }
 0x523   : > { %2599 = vpow2.f32 %v1492_v27 }
 0x525   : > { %v2598_v28 = vpop.eup %2597 }
 0x526   : > { %v1373_v29 = vsel %vm1070_vm3, %v2598_v28, 0.0 }
 0x527   : > { %1374 = vadd.xlane.f32.xlu1 %v1373_v29 }
 0x52d   : > { %v2600_v30 = vpop.eup %2599 }
 0x52e   : > { %v1494_v31 = vsel %vm1070_vm3, %v2600_v30, 0.0 }
 0x52f   : > { %1495 = vadd.xlane.f32.xlu0 %v1494_v31  ;;  %v2587_v31 = vld [vmem:[#allocation24] sm:$0xff]  }
 0x537   : > { %v1133_v32 = vpop.xlane.xlu1 %1132 }
 0x538   : > { %2601 = vrcp.f32 %v1133_v32  ;;  %1500 = vrot.lane.b32.xlu1 %v2169_v16, %s3271_s2  ;;  %v2588_v32 = vld [vmem:[#allocation24 + $0x8] sm:$0xff]  }
 0x53b   : > { %v1259_v35 = vpop.permute.xlu1 %1258 }
 0x53c   : > { %v1264_v37 = vsel %vm1140_vm4, %v1259_v35, 0 }
 0x542   : > { %v2602_v33 = vpop.eup %2601 }
 0x543   : > { %v1135_v34 = vmul.f32 %v2602_v33, %v2594_v14 }
 0x545   : > { %1379 = vrot.lane.b32.xlu0 %v2169_v16, %s3269_s25  ;;  %v1136_v36 = vpack.c.bf16 %v1135_v34, %v1135_v34  ;;  %s3127_s25 = sshll.u32 %s3275_s24, 4  ;;  %s3128_s25 = int_to_ptr.vmem [resolvable:$false] %s3127_s25 }
 0x546   : > { %s3129_s3 = scalar_lea.vmem %s3128_s25, 256  ;;  %p3130_p4 = scmp.lt.s32.totalorder %s4030_s28, %s3128_s25 }
 0x547   : > { %2272 = vmatmul.mubr.msk.bf16.vlgmr.msra.gmra.mrb[8].mxu0 %vm1070_vm3, %v1136_v36  ;;  %v2182_v36 = vld [vmem:[#allocation21] ss:$0 sm:$0xff]  ;;  %p3131_p9 = scmp.lt.s32.totalorder %s3129_s3, %s3123_s20 }
 0x548   : > { %2282 = vmatpush3.bf16.msra.mxu0 %v1264_v37  ;;  %2283 = vmatprep.mubr.msk.bf16.mxu0 %vm3268_vm0, %v3267_v0 }
 0x549   : > { %2293 = vmatprep.subr.bf16.mxu0 %v3267_v0  ;;  %p3132_p0 = por %p3131_p9, %p3130_p4 }
 0x54b   : > { %p3133_p7 = pnand %p3132_p0, %p3126_p13 }
 0x5ac   : > { %v1251_v38 = vpop.xlane.xlu0 %1250 }
 0x5ad   : > { %2603 = vrcp.f32 %v1251_v38  ;;  %v2183_v38 = vld [vmem:[#allocation22] ss:$0 sm:$0xff] }
 0x5b4   : > { %v1375_v39 = vpop.xlane.xlu1 %1374 }
 0x5b5   : > { %2605 = vrcp.f32 %v1375_v39 }
 0x5b7   : > { %v2604_v40 = vpop.eup %2603 }
 0x5b8   : > { %v1253_v41 = vmul.f32 %v2604_v40, %v2596_v23  ;;  %v1501_v48 = vpop.permute.xlu1 %1500 }
 0x5b9   : > { %v1506_v50 = vsel %vm1140_vm4, %v1501_v48, 0 }
 0x5ba   : > { %v1254_v42 = vpack.c.bf16 %v1253_v41, %v1253_v41 }
 0x5bc   : > { %2284 = vmatmul.mubr.msk.bf16.vlgmr.msra.gmra.mrb[12].mxu0 %vm1070_vm3, %v1254_v42  ;;  %v1496_v43 = vpop.xlane.xlu0 %1495  ;;  %v2589_v42 = vld [vmem:[#allocation27] sm:$0xff]  }
 0x5bd   : > { %2607 = vrcp.f32 %v1496_v43  ;;  %2295 = vmatprep.mubr.msk.bf16.mxu0 %vm3268_vm0, %v3267_v0  ;;  %v2590_v43 = vld [vmem:[#allocation27 + $0x8] sm:$0xff]  }
 0x5bf   : > { %v2606_v44 = vpop.eup %2605 }
 0x5c0   : > { %v1377_v45 = vmul.f32 %v2606_v44, %v2598_v28  ;;  %v1380_v46 = vpop.permute.xlu0 %1379  ;;  %v2591_v44 = vld [vmem:[#allocation27 + $0x10] sm:$0xff]  }
 0x5c1   : > { %v1385_v47 = vsel %vm1140_vm4, %v1380_v46, 0  ;;  %v2184_v46 = vld [vmem:[#allocation25] ss:$0 sm:$0xff] }
 0x5c2   : > { %2294 = vmatpush3.bf16.msra.mxu0 %v1385_v47  ;;  %v1378_v49 = vpack.c.bf16 %v1377_v45, %v1377_v45  ;;  %v2592_v45 = vld [vmem:[#allocation27 + $0x18] sm:$0xff]  }
 0x5c3   : > { %2305 = vmatprep.subr.bf16.mxu0 %v3267_v0 }
 0x5c5   : > { %2296 = vmatmul.mubr.msk.bf16.vlgmr.msra.gmra.mrb[16].mxu0 %vm1070_vm3, %v1378_v49 }
 0x5c6   : > { %2306 = vmatpush3.bf16.msra.mxu0 %v1506_v50  ;;  %2307 = vmatprep.mubr.msk.bf16.mxu0 %vm3268_vm0, %v3267_v0 }
 0x5c7   : > { %v2608_v51 = vpop.eup %2607  ;;  %2319 = vmatprep.subr.bf16.mxu0 %v3267_v0 }
 0x5c8   : > { %v1498_v52 = vmul.f32 %v2608_v51, %v2600_v30 }
 0x5ca   : > { %v1499_v53 = vpack.c.bf16 %v1498_v52, %v1498_v52 }
 0x5cd   : > { %2308 = vmatmul.mubr.msk.bf16.vlgmr.msra.gmra.mrb[20].mxu0 %vm1070_vm3, %v1499_v53 }
 0x5ce   : > { %2323 = vmatprep.mubr.msk.bf16.mxu0 %vm3268_vm0, %v3267_v0  ;;  %2320 = vmatpush3.bf16.msra.mxu0 %v2587_v31 }
 0x5cf   : > { %2321 = vmatprep.subr.bf16.mxu0 %v3267_v0 }
 0x5d2   : > { %2322 = vmatpush3.bf16.msra.mxu0 %v2588_v32 }
 0x61a   : > { %v1178_v54 = vpop.f32.mrb[8].mxu0 }
 0x61b   : > { %v1184_v55 = vpack.c.bf16 %v1178_v54, %v1178_v54  ;;  %v2273_v56 = vpop.f32.mrb[9].mxu0 }
 0x61c   : > { %v1181_v57 = vpop.f32.mrb[10].mxu0 }
 0x61d   : > { %1186 = vst.msk [vmem:[#allocation3] sm:$0xf] %vm1185_vm5, %v1184_v55  ;;  %v2274_v58 = vpop.f32.mrb[11].mxu0 }
 0x61e   : > { %v2188_v58 = vld [vmem:[#allocation28] ss:$0 sm:$0xff] }
 0x68f   : > { %v1300_v59 = vpop.f32.mrb[12].mxu0 }
 0x690   : > { %v2200_v60 = vpack.c.bf16 %v1300_v59, %v1300_v59  ;;  %v2285_v61 = vpop.f32.mrb[13].mxu0 }
 0x691   : > { %v1303_v62 = vpop.f32.mrb[14].mxu0 }
 0x692   : > { %1310 = vrot.lane.b32.xlu1 %v2200_v60, %s3272_s30  ;;  %v2286_v63 = vpop.f32.mrb[15].mxu0 }
 0x698   : > { %v1421_v2 = vpop.f32.mrb[16].mxu0 }
 0x699   : > { %v2201_v5 = vpack.c.bf16 %v1421_v2, %v1421_v2  ;;  %v2297_v6 = vpop.f32.mrb[17].mxu0 }
 0x69a   : > { %v1424_v7 = vpop.f32.mrb[18].mxu0 }
 0x69b   : > { %1431 = vrot.lane.b32.xlu0 %v2201_v5, %s3273_s26  ;;  %v2298_v8 = vpop.f32.mrb[19].mxu0 }
 0x6a0   : > { %v1542_v9 = vpop.f32.mrb[20].mxu0 }
 0x6a1   : > { %v2202_v10 = vpack.c.bf16 %v1542_v9, %v1542_v9  ;;  %v2309_v11 = vpop.f32.mrb[21].mxu0 }
 0x6a2   : > { %v1545_v12 = vpop.f32.mrb[22].mxu0 }
 0x6a3   : > { %1552 = vrot.lane.b32.xlu1 %v2202_v10, %s3274_s29  ;;  %v2310_v13 = vpop.f32.mrb[23].mxu0  ;;  %v2194_v12 = vld [vmem:[#allocation30] ss:$0 sm:$0xff] }
 0x704   : > { %v1311_v14 = vpop.permute.xlu1 %1310 }
 0x705   : > { %1314 = vst.msk [vmem:[#allocation3] sm:$0xf] %vm1313_vm6, %v1311_v14  ;;  %v2195_v14 = vld [vmem:[#allocation31] ss:$0 sm:$0xff] }
 0x70d   : > { %v1432_v15 = vpop.permute.xlu0 %1431 }
 0x70e   : > { %1435 = vst.msk [vmem:[#allocation3] sm:$0xf] %vm1434_vm7, %v1432_v15 }
 0x715   : > { %v1553_v16 = vpop.permute.xlu1 %1552 }
 0x716   : > { %1556 = vst.msk [vmem:[#allocation3] sm:$0xf] %vm1555_vm8, %v1553_v16 }
 0x71d   : > { %v1557_v17 = vld [vmem:[#allocation3] sm:$0xf] }
 0x71e   : > { %2316 = vmatmul.mubr.msk.bf16.vlgmr.msra.gmra.mrb[20].mxu1 %vm882_vm1, %v1557_v17 }
 0x71f   : > { %2335 = vmatprep.mubr.msk.bf16.mxu1 %vm3268_vm0, %v3267_v0  ;;  %2328 = vmatpush3.bf16.msra.mxu1 %v2589_v42 }
 0x720   : > { %2329 = vmatprep.subr.bf16.mxu1 %v3267_v0 }
 0x723   : > { %2330 = vmatpush3.bf16.msra.mxu1 %v2590_v43 }
 0x724   : > { %2331 = vmatprep.subr.bf16.mxu1 %v3267_v0 }
 0x727   : > { %2332 = vmatpush3.bf16.msra.mxu1 %v2591_v44 }
 0x728   : > { %2333 = vmatprep.subr.bf16.mxu1 %v3267_v0 }
 0x72b   : > { %2334 = vmatpush3.bf16.msra.mxu1 %v2592_v45 }
 0x7f1   : > { %v1618_v19 = vpop.f32.mrb[20].mxu1 }
 0x7f2   : > { %v1619_v20 = vadd.f32 %v2178_v18, %v1618_v19  ;;  %v2317_v21 = vpop.f32.mrb[21].mxu1 }
 0x7f3   : > { %v1621_v22 = vpop.f32.mrb[22].mxu1 }
 0x7f4   : > { %v2318_v23 = vpop.f32.mrb[23].mxu1  ;;  %v1624_v24 = vadd.f32 %v1619_v20, %v3922_v3 }
 0x7f6   : > { %v1627_v25 = vsel %vm882_vm1, %v1624_v24, 0.0 }
 0x7f7   : > { %1628 = vadd.xlane.f32.xlu0 %v1627_v25 }
 0x884   : > { %v1629_v26 = vpop.xlane.xlu0 %1628 }
 0x885   : > { %v1631_v27 = vmul.f32 0.03125, %v1629_v26 }
 0x887   : > { %v1632_v28 = vsub.f32 %v1624_v24, %v1631_v27 }
 0x889   : > { %v1633_v29 = vmul.f32 %v1632_v28, %v1632_v28 }
 0x88b   : > { %v1634_v30 = vsel %vm882_vm1, %v1633_v29, 0.0 }
 0x88c   : > { %1635 = vadd.xlane.f32.xlu1 %v1634_v30 }
 0x919   : > { %v1636_v33 = vpop.xlane.xlu1 %1635 }
 0x91a   : > { %v1637_v34 = vmul.f32 0.03125, %v1636_v33 }
 0x91c   : > { %v1638_v35 = vadd.f32 1e-12, %v1637_v34 }
 0x91e   : > { %2609 = vrsqrt.f32 %v1638_v35 }
 0x928   : > { %v2610_v3 = vpop.eup %2609 }
 0x929   : > { %v1640_v37 = vmul.f32 %v2610_v3, %v1632_v28 }
 0x92b   : > { %v1647_v39 = vmul.f32 %v2182_v36, %v1640_v37 }
 0x92d   : > { %v1654_v40 = vadd.f32 %v2183_v38, %v1647_v39 }
 0x92f   : > { %v1655_v41 = vpack.c.bf16 %v1654_v40, %v1654_v40 }
 0x931   : > { %2324 = vmatmul.mubr.msk.bf16.vlgmr.msra.gmra.mrb[24].mxu0 %vm882_vm1, %v1655_v41 }
 0xa04   : > { %v1716_v47 = vpop.f32.mrb[24].mxu0 }
 0xa05   : > { %v1717_v48 = vadd.f32 %v2184_v46, %v1716_v47  ;;  %v2325_v49 = vpop.f32.mrb[25].mxu0 }
 0xa06   : > { %v1719_v50 = vpop.f32.mrb[26].mxu0 }
 0xa07   : > { %v1723_v51 = vmul.f32 0.70710677, %v1717_v48  ;;  %v2326_v52 = vpop.f32.mrb[27].mxu0  ;;  %v1722_v54 = vmul.f32 0.5, %v1717_v48 }
 0xa09   : > { %2611 = verf.f32 %v1723_v51 }
 0xa13   : > { %v2612_v53 = vpop.eup %2611 }
 0xa14   : > { %v1725_v55 = vadd.f32 1.0, %v2612_v53 }
 0xa16   : > { %v1726_v56 = vmul.f32 %v1725_v55, %v1722_v54 }
 0xa18   : > { %v1727_v57 = vpack.c.bf16 %v1726_v56, %v1726_v56 }
 0xa1a   : > { %2336 = vmatmul.mubr.msk.bf16.vlgmr.msra.gmra.mrb[24].mxu1 %vm1767_vm9, %v1727_v57 }
 0xaed   : > { %v1805_v59 = vpop.f32.mrb[24].mxu1 }
 0xaee   : > { %v1806_v0 = vadd.f32 %v2188_v58, %v1805_v59  ;;  %v2337_v60 = vpop.f32.mrb[25].mxu1 }
 0xaef   : > { %v1808_v61 = vpop.f32.mrb[26].mxu1 }
 0xaf0   : > { %v2338_v62 = vpop.f32.mrb[27].mxu1  ;;  %v1811_v63 = vadd.f32 %v1806_v0, %v1654_v40 }
 0xaf2   : > { %v1814_v1 = vsel %vm882_vm1, %v1811_v63, 0.0 }
 0xaf3   : > { %1815 = vadd.xlane.f32.xlu0 %v1814_v1 }
 0xb80   : > { %v1816_v2 = vpop.xlane.xlu0 %1815 }
 0xb81   : > { %v1817_v4 = vmul.f32 0.03125, %v1816_v2 }
 0xb83   : > { %v1818_v5 = vsub.f32 %v1811_v63, %v1817_v4 }
 0xb85   : > { %v1819_v6 = vmul.f32 %v1818_v5, %v1818_v5 }
 0xb87   : > { %v1820_v7 = vsel %vm882_vm1, %v1819_v6, 0.0 }
 0xb88   : > { %1821 = vadd.xlane.f32.xlu0 %v1820_v7 }
 0xc15   : > { %v1822_v8 = vpop.xlane.xlu0 %1821 }
 0xc16   : > { %v1823_v9 = vmul.f32 0.03125, %v1822_v8 }
 0xc18   : > { %v1824_v10 = vadd.f32 1e-12, %v1823_v9 }
 0xc1a   : > { %2613 = vrsqrt.f32 %v1824_v10 }
 0xc24   : > { %v2614_v11 = vpop.eup %2613 }
 0xc25   : > { %v1826_v13 = vmul.f32 %v2614_v11, %v1818_v5 }
 0xc27   : > { %v1833_v15 = vmul.f32 %v2194_v12, %v1826_v13 }
 0xc29   : > { %v1840_v16 = vadd.f32 %v2195_v14, %v1833_v15 }
 0xc2b   : > { %1841 = vst.msk [vmem:[%s850_s10] sm:$0xff] %vm882_vm1, %v1840_v16 }
 0xc2c   : > { %3136 = shalt.err (!%p3133_p7)
}
 0xc2d   : > { %s3137_s19 = scalar_lea.hbm %s4028_s8, 128  ;;  %s3141_s26 = scalar_lea.hbm %s4196_s6, 256 }
 0xc2e   : > { %p3138_p12 = scmp.ne.s32.totalorder %s4028_s8, %s3137_s19  ;;  %p3142_p1 = scmp.lt.u32.totalorder %s4028_s8, %s4196_s6 }
 0xc2f   : > { %p3143_p5 = scmp.lt.u32.totalorder %s3141_s26, %s3137_s19  ;;  %p3145_p3 = scmp.lt.u32.totalorder %s3137_s19, %s4028_s8 }
 0xc30   : > { %p3139_p2 = pnand %p3138_p12, %p4197_p11 }
 0xc31   : > { %p3144_p8 = por %p3143_p5, %p3142_p1 }
 0xc32   : > { %p3140_p10 = pneg %p3139_p2 }
 0xc33   : > { %p3146_p6 = por %p3145_p3, %p3144_p8 }
 0xc35   : > { %p3147_p13 = pnand %p3146_p6, %p3140_p10 }
 0xc37   : > { %3150 = shalt.err (!%p3147_p13)
}
 0xc38   : > { %2407 = dma.vmem_to_hbm [thread:$0]  (%p4197_p11), %s4030_s28, 128, %s4028_s8, %s1843_s9  }
 0xc39 PF: > { %s4198_s21 = sld [smem:[#allocation46_spill]]  ;;  %s4199_s10 = sld [smem:[#allocation51_spill]] }
 0xc3a   : > { %p4200_p4 = scmp.ne.s32.totalorder %s4166_s22, 0 }
 0xc3f   : > { %s1869_s5 = sand.u32 1, %s4198_s21   ;;  %p4201_p9 = scmp.ge.s32.totalorder %s4199_s10, 2 }
 0xc40   : > { %s1870_s7 = scalar_lea.sflag [#allocation6], %s1869_s5 }
 0xc41   : > { %p2466_p0 = pnand %p4201_p9, %p4200_p4 }
 0xc43   : > { %3220 = dma.done.wait (!%p2466_p0), %s1870_s7, 128  }
 0xc44   : > { %3222 = vsyncadd (!%p2466_p0), %s1870_s7, 4294967168  ;;  %s45_s19 = sadd.s32 1, %s4199_s10   ;;  %s4202_s20 = sld [smem:[#allocation47_spill]] }
 0xc45   : > { %p42_p7 = scmp.ge.s32.totalorder %s45_s19, 4   ;;  %s4203_s28 = sld [smem:[#allocation48_spill]] }
 0xc46   : > { %s4204_s23 = smov %s3778_s27  ;;  %s4205_s30 = sld [smem:[#allocation50_spill]] }
 0xc47   : > { %s4207_s29 = smov %s4204_s23  ;;  %44 = sbr.rel (!%p42_p7) target bundleno = 30 (0x1e), region = 221 }
 0xc4a   : > { %s4206_s27 = smov %s4202_s20 }
 0xc4e   :  { %1875 = vsyncpa [#allocation5], 1 }
 0xc4f   :  { %1877 = vsyncpa [#allocation5 + $0x1], 1 }
 0xc50   :  { %1878 = vsyncpa [#allocation8], 1 }
 0xc51   :  { %1880 = vsyncpa [#allocation8 + $0x1], 1 }
 0xc52   :  { %1881 = vsyncpa [#allocation11], 1 }
 0xc53   :  { %1882 = vsyncpa [#allocation14], 1 }
 0xc54   :  { %1883 = vsyncpa [#allocation17], 1 }
 0xc55   :  { %1884 = vsyncpa [#allocation20], 1 }
 0xc56   :  { %1885 = vsyncpa [#allocation23], 1 }
 0xc57   :  { %1886 = vsyncpa [#allocation26], 1 }
 0xc58   :  { %1887 = vsyncpa [#allocation29], 1 }
 0xc59   :  { %1888 = vsyncpa [#allocation32], 1 }
 0xc5a   :  { %1889 = vsyncpa [#allocation6], 1 }
 0xc5b   :  { %1891 = vsyncpa [#allocation6 + $0x1], 1 }

</bundles_post_ra>
